<compile_context>
chip_gen: v6e
topology: v6e:2x2x1
jax: 0.10.0
libtpu: 0.0.40
codegen_flags: <defaults>
</compile_context>

<pallas_src>
import math
import numpy as np
import jax
import jax.numpy as jnp
from jax.experimental import pallas as pl
from jax.experimental.pallas import tpu as pltpu

BN_EPS = 1e-5
KSIZE, STRIDE, PAD = 5, 2, 2


# ---------------------------------------------------------------------------
# Fused encoder forward (single grid-less pallas_call, all VMEM resident)
# ---------------------------------------------------------------------------
def encoder_forward(x, prep, *, dim_out):
    """x: (N, C, H, W) f32 NCHW input.  prep: prepared weights (see below)."""
    N, C0, H1, W1 = x.shape
    Ho1 = H1 // 2
    L1 = W1 * C0
    bf16, f32 = jnp.bfloat16, jnp.float32

    # ---- static dims derived from the prepared weights ---------------------
    WoC1 = prep["rc1"].shape[1]          # Wo1 * C1
    H2, L2 = Ho1, WoC1
    Ho2 = H2 // 2
    WoC2 = prep["rc2"].shape[1]          # Wo2 * C2
    H3, L3 = Ho2, WoC2
    Ho3 = H3 // 2
    L4 = prep["rc3"].shape[1]            # Wo3 * C3
    F = Ho3 * L4                         # flatten length (= fc1 fan-in)
    dpad = prep["w3t"].shape[1]          # dim_out padded up to 128 lanes

    # ---- layer-1 patch matrix built once in XLA (outside the kernel) -------
    # B1[n*Ho1 + oh, kh*L1 + iw*C0 + ci] = x[n, ci, 2*oh + kh - 2, iw] (0 if pad)
    a = jnp.transpose(x, (0, 2, 3, 1))                        # (N, H, W, C)
    a = jnp.pad(a, ((0, 0), (PAD, PAD), (0, 0), (0, 0)))
    blocks = [a[:, kh:kh + H1:2, :, :].reshape(N * Ho1, L1) for kh in range(KSIZE)]
    b1 = jnp.concatenate(blocks, axis=1).astype(bf16)         # (N*Ho1, 5*L1)

    args = (b1,
            prep["rc1"], prep["p1"], prep["pt1"], prep["g1"], prep["bb1"],
            prep["rc2"], prep["p2"], prep["pt2"], prep["g2"], prep["bb2"],
            prep["rc3"], prep["p3"], prep["pt3"], prep["g3"], prep["bb3"],
            prep["w1h"], prep["fb1"], prep["w2t"], prep["fb2"],
            prep["w3t"], prep["fb3"])

    # ---- the fused kernel ---------------------------------------------------
    def kernel(b1_ref,
               rc1_ref, p1_ref, pt1_ref, g1_ref, bb1_ref,
               rc2_ref, p2_ref, pt2_ref, g2_ref, bb2_ref,
               rc3_ref, p3_ref, pt3_ref, g3_ref, bb3_ref,
               w1h_ref, fb1_ref, w2t_ref, fb2_ref, w3t_ref, fb3_ref,
               o_ref,
               apad2_ref, b2_ref, apad3_ref, b3_ref, y3_ref, flat_ref):

        def conv_bn_relu(bmat, rc_ref, p_ref, pt_ref, g_ref, bb_ref):
            # bmat: (N*Ho, 5*L) bf16 patch matrix -> ONE stacked-K GEMM.
            # Conv bias omitted (cancelled by the training-mode BN mean).
            acc = jnp.dot(bmat, rc_ref[...], preferred_element_type=f32)
            p, pt = p_ref[...], pt_ref[...]                 # (WoC, C), (C, WoC)
            cout = p.shape[1]
            count = acc.shape[0] * (acc.shape[1] // cout)   # N*Ho*Wo (static)
            inv = 1.0 / float(count)
            mean = jnp.dot(jnp.sum(acc, axis=0, keepdims=True), p,
                           preferred_element_type=f32) * inv            # (1, C)
            cent = acc - jnp.dot(mean, pt, preferred_element_type=f32)
            var = jnp.dot(jnp.sum(cent * cent, axis=0, keepdims=True), p,
                          preferred_element_type=f32) * inv             # (1, C)
            scale = g_ref[...] * jax.lax.rsqrt(var + BN_EPS)            # (1, C)
            y = cent * jnp.dot(scale, pt, preferred_element_type=f32) + bb_ref[...]
            return jnp.maximum(y, 0.0)

        def stage(y, apad_ref, b_ref, h_in, l_in):
            # y: (N*h_in, l_in) f32 activation = next layer's input.
            # Fill a zero-padded per-sample slab, then pack the 5 kh row
            # selections along the contraction dim of the patch buffer using
            # sublane-strided (stride=2) reads -> next conv is a single GEMM.
            hp, ho = h_in + 2 * PAD, h_in // 2
            apad_ref[...] = jnp.zeros(apad_ref.shape, f32)
            for s in range(N):
                apad_ref[s * hp + PAD: s * hp + PAD + h_in, :] = \
                    y[s * h_in:(s + 1) * h_in, :]
            for s in range(N):
                for kh in range(KSIZE):
                    rows = apad_ref[pl.ds(s * hp + kh, ho, stride=2), :]
                    b_ref[s * ho:(s + 1) * ho, kh * l_in:(kh + 1) * l_in] = \
                        rows.astype(bf16)
            return b_ref[...]

        y1 = conv_bn_relu(b1_ref[...], rc1_ref, p1_ref, pt1_ref, g1_ref, bb1_ref)
        b2 = stage(y1, apad2_ref, b2_ref, H2, L2)
        y2 = conv_bn_relu(b2, rc2_ref, p2_ref, pt2_ref, g2_ref, bb2_ref)
        b3 = stage(y2, apad3_ref, b3_ref, H3, L3)
        y3 = conv_bn_relu(b3, rc3_ref, p3_ref, pt3_ref, g3_ref, bb3_ref)

        # Flatten (torch NCHW view order folded into w1h), then fc1/2/3 + ReLU.
        # fc1 is ONE GEMM with K = Ho3*Wo3*C3.
        y3_ref[...] = y3
        for oh in range(Ho3):
            flat_ref[:, oh * L4:(oh + 1) * L4] = \
                y3_ref[pl.ds(oh, N, stride=Ho3), :].astype(bf16)
        h = jnp.dot(flat_ref[...], w1h_ref[...],
                    preferred_element_type=f32) + fb1_ref[...]
        h = jnp.maximum(h, 0.0)
        h = jnp.dot(h.astype(bf16), w2t_ref[...],
                    preferred_element_type=f32) + fb2_ref[...]
        h = jnp.maximum(h, 0.0)
        h = jnp.dot(h.astype(bf16), w3t_ref[...],
                    preferred_element_type=f32) + fb3_ref[...]
        o_ref[...] = jnp.maximum(h, 0.0)

    scratch = [
        pltpu.VMEM((N * (H2 + 2 * PAD), L2), f32),        # padded act, conv2 in
        pltpu.VMEM((N * Ho2, KSIZE * L2), bf16),          # patch matrix, conv2
        pltpu.VMEM((N * (H3 + 2 * PAD), L3), f32),        # padded act, conv3 in
        pltpu.VMEM((N * Ho3, KSIZE * L3), bf16),          # patch matrix, conv3
        pltpu.VMEM((N * Ho3, L4), f32),                   # conv3 output
        pltpu.VMEM((N, F), bf16),                         # flattened features
    ]

    # Explicit VMEM budget from the actual resident footprint (+ headroom).
    resident = sum(int(np.prod(arr.shape)) * arr.dtype.itemsize for arr in args)
    resident += N * dpad * 4
    resident += (N * (H2 + 2 * PAD) * L2 + N * (H3 + 2 * PAD) * L3
                 + N * Ho3 * L4) * 4
    resident += (N * Ho2 * KSIZE * L2 + N * Ho3 * KSIZE * L3 + N * F) * 2
    vmem_limit = int(min(96 * 2 ** 20, max(16 * 2 ** 20, 2 * resident + (4 << 20))))

    out = pl.pallas_call(
        kernel,
        out_shape=jax.ShapeDtypeStruct((N, dpad), f32),
        in_specs=[pl.BlockSpec(memory_space=pltpu.MemorySpace.VMEM)] * len(args),
        out_specs=pl.BlockSpec(memory_space=pltpu.MemorySpace.VMEM),
        scratch_shapes=scratch,
        compiler_params=pltpu.CompilerParams(vmem_limit_bytes=vmem_limit),
    )(*args)
    return out[:, :dim_out]


encoder_forward_jit = jax.jit(encoder_forward, static_argnames=("dim_out",))


# ---------------------------------------------------------------------------
# One-time parameter preparation (host side, outside the forward pass)
# ---------------------------------------------------------------------------
def prepare_encoder(params, im_size):
    """Precompute stacked GEMM-layout conv/fc weights once (cuDNN-style)."""
    conv_ws = [params["conv1_w"], params["conv2_w"], params["conv3_w"]]
    sizes = [im_size]
    for _ in range(3):
        sizes.append((sizes[-1] + 2 * PAD - KSIZE) // STRIDE + 1)   # 16->8->4->2

    prep = {}
    for l in range(3):
        h_in, h_out = sizes[l], sizes[l + 1]          # square: W == H
        w_in, w_out = h_in, h_out
        cw = np.asarray(conv_ws[l], np.float32)       # (Cout, Cin, 5, 5) OIHW
        cout, cin = cw.shape[0], cw.shape[1]
        L = w_in * cin
        # Stacked-K conv weight: (5*W*Cin, Wo*Cout), kh-major rows.
        rc = np.zeros((KSIZE * L, w_out * cout), np.float32)
        for kh in range(KSIZE):
            for ow in range(w_out):
                for kw in range(KSIZE):
                    iw = STRIDE * ow + kw - PAD
                    if 0 <= iw < w_in:
                        rc[kh * L + iw * cin: kh * L + (iw + 1) * cin,
                           ow * cout:(ow + 1) * cout] = cw[:, :, kh, kw].T
        prep[f"rc{l + 1}"] = jnp.asarray(rc, jnp.bfloat16)
        # Channel reduce / broadcast helpers across the (ow, co) lane blocks.
        p = np.tile(np.eye(cout, dtype=np.float32), (w_out, 1))     # (Wo*Cout, Cout)
        prep[f"p{l + 1}"] = jnp.asarray(p)
        prep[f"pt{l + 1}"] = jnp.asarray(np.ascontiguousarray(p.T))
        prep[f"g{l + 1}"] = jnp.asarray(
            np.asarray(params[f"bn{l + 1}_g"], np.float32).reshape(1, -1))
        beta = np.asarray(params[f"bn{l + 1}_b"], np.float32)
        prep[f"bb{l + 1}"] = jnp.asarray(np.tile(beta, w_out).reshape(1, -1))

    # fc1: fold torch's NCHW x.view(N,-1) flatten order + our (oh, ow, c)
    # lane layout into the weight -> single GEMM in the kernel.
    h3 = sizes[3]
    c3 = int(np.asarray(conv_ws[2]).shape[0])
    d1 = int(params["fc1_w"].shape[0])
    w1 = np.asarray(params["fc1_w"], np.float32).reshape(d1, c3, h3, h3)
    w1h = np.ascontiguousarray(w1.transpose(2, 3, 1, 0)).reshape(h3 * h3 * c3, d1)
    prep["w1h"] = jnp.asarray(w1h, jnp.bfloat16)
    prep["fb1"] = jnp.asarray(
        np.asarray(params["fc1_b"], np.float32).reshape(1, -1))
    prep["w2t"] = jnp.asarray(
        np.asarray(params["fc2_w"], np.float32).T, jnp.bfloat16)
    prep["fb2"] = jnp.asarray(
        np.asarray(params["fc2_b"], np.float32).reshape(1, -1))
    # Final fc: zero-pad dim_out up to a multiple of 128 for lane-dense stores.
    w3 = np.asarray(params["fc3_w"], np.float32)      # (dim_out, d2)
    dim_out, d2 = w3.shape
    dpad = ((dim_out + 127) // 128) * 128
    w3t = np.zeros((d2, dpad), np.float32)
    w3t[:, :dim_out] = w3.T
    fb3 = np.zeros((1, dpad), np.float32)
    fb3[0, :dim_out] = np.asarray(params["fc3_b"], np.float32)
    prep["w3t"] = jnp.asarray(w3t, jnp.bfloat16)
    prep["fb3"] = jnp.asarray(fb3)
    return prep


# ---------------------------------------------------------------------------
# Pure-JAX f32 reference (mirrors the PyTorch forward, training-mode BN)
# ---------------------------------------------------------------------------
def encoder_forward_ref(x, params):
    h = x
    for i in (1, 2, 3):
        w = params[f"conv{i}_w"]
        y = jax.lax.conv_general_dilated(
            h, w, window_strides=(2, 2), padding=((2, 2), (2, 2)),
            dimension_numbers=("NCHW", "OIHW", "NCHW"))
        y = y + params[f"conv{i}_b"].reshape(1, -1, 1, 1)
        mean = jnp.mean(y, axis=(0, 2, 3), keepdims=True)
        var = jnp.mean((y - mean) ** 2, axis=(0, 2, 3), keepdims=True)
        y = (y - mean) * jax.lax.rsqrt(var + BN_EPS)
        y = y * params[f"bn{i}_g"].reshape(1, -1, 1, 1) \
              + params[f"bn{i}_b"].reshape(1, -1, 1, 1)
        h = jnp.maximum(y, 0.0)
    h = h.reshape(h.shape[0], -1)
    for i in (1, 2, 3):
        h = jnp.maximum(h @ params[f"fc{i}_w"].T + params[f"fc{i}_b"], 0.0)
    return h


# ---------------------------------------------------------------------------
# Deterministic parameter init + run
# ---------------------------------------------------------------------------
def make_params(key, dim_in, dim_out, dim1, dim2, im_size):
    dim_hidden = [dim1, dim1 * 2, dim1 * 4, dim2, dim2]
    flat = dim_hidden[2] * math.ceil(im_size / 8) ** 2
    specs = {
        "conv1_w": (dim_hidden[0], dim_in, 5, 5), "conv1_b": (dim_hidden[0],),
        "conv2_w": (dim_hidden[1], dim_hidden[0], 5, 5), "conv2_b": (dim_hidden[1],),
        "conv3_w": (dim_hidden[2], dim_hidden[1], 5, 5), "conv3_b": (dim_hidden[2],),
        "bn1_g": (dim_hidden[0],), "bn1_b": (dim_hidden[0],),
        "bn2_g": (dim_hidden[1],), "bn2_b": (dim_hidden[1],),
        "bn3_g": (dim_hidden[2],), "bn3_b": (dim_hidden[2],),
        "fc1_w": (dim_hidden[3], flat), "fc1_b": (dim_hidden[3],),
        "fc2_w": (dim_hidden[4], dim_hidden[3]), "fc2_b": (dim_hidden[4],),
        "fc3_w": (dim_out, dim_hidden[4]), "fc3_b": (dim_out,),
    }
    params = {}
    keys = jax.random.split(key, len(specs))
    for k, (name, shape) in zip(keys, sorted(specs.items())):
        params[name] = (0.05 * jax.random.normal(k, shape)).astype(jnp.float32)
    return params


if __name__ == "__main__":
    # Small, module-consistent shapes: dim_in=4, dim1=8, dim2=64, dim_out=32,
    # im_size=16  ->  conv stack 16->8->4->2, flatten = 32*2*2 = 128.
    dim_in, dim_out, dim1, dim2, im_size = 4, 32, 8, 64, 16
    batch = 2

    root = jax.random.PRNGKey(0)
    kx, kp = jax.random.split(root)
    x = jax.random.normal(kx, (batch, dim_in, im_size, im_size), dtype=jnp.float32)
    params = make_params(kp, dim_in, dim_out, dim1, dim2, im_size)

    # One-time weight preparation (outside the forward pass).
    prep = prepare_encoder(params, im_size)

    out = jax.block_until_ready(encoder_forward_jit(x, prep, dim_out=dim_out))
    ref = jax.block_until_ready(jax.jit(encoder_forward_ref)(x, params))

    assert out.shape == (batch, dim_out), out.shape
    # bf16 MXU operands (f32 accumulation) vs. the pure-f32 reference: use a
    # correspondingly looser tolerance.
    np.testing.assert_allclose(np.asarray(out), np.asarray(ref),
                               rtol=3e-2, atol=3e-2)
    print("KERNEL_OK")
</pallas_src>

<mosaic_0001>
module attributes {stable_mosaic.version = 11 : i64} {
  func.func @kernel(%arg0: memref<16x320xbf16, #tpu.memory_space<vmem>>, %arg1: memref<320x64xbf16, #tpu.memory_space<vmem>>, %arg2: memref<64x8xf32, #tpu.memory_space<vmem>>, %arg3: memref<8x64xf32, #tpu.memory_space<vmem>>, %arg4: memref<1x8xf32, #tpu.memory_space<vmem>>, %arg5: memref<1x64xf32, #tpu.memory_space<vmem>>, %arg6: memref<320x64xbf16, #tpu.memory_space<vmem>>, %arg7: memref<64x16xf32, #tpu.memory_space<vmem>>, %arg8: memref<16x64xf32, #tpu.memory_space<vmem>>, %arg9: memref<1x16xf32, #tpu.memory_space<vmem>>, %arg10: memref<1x64xf32, #tpu.memory_space<vmem>>, %arg11: memref<320x64xbf16, #tpu.memory_space<vmem>>, %arg12: memref<64x32xf32, #tpu.memory_space<vmem>>, %arg13: memref<32x64xf32, #tpu.memory_space<vmem>>, %arg14: memref<1x32xf32, #tpu.memory_space<vmem>>, %arg15: memref<1x64xf32, #tpu.memory_space<vmem>>, %arg16: memref<128x64xbf16, #tpu.memory_space<vmem>>, %arg17: memref<1x64xf32, #tpu.memory_space<vmem>>, %arg18: memref<64x64xbf16, #tpu.memory_space<vmem>>, %arg19: memref<1x64xf32, #tpu.memory_space<vmem>>, %arg20: memref<64x128xbf16, #tpu.memory_space<vmem>>, %arg21: memref<1x128xf32, #tpu.memory_space<vmem>>, %arg22: memref<2x128xf32, #tpu.memory_space<vmem>>, %arg23: memref<24x64xf32, #tpu.memory_space<vmem>>, %arg24: memref<8x320xbf16, #tpu.memory_space<vmem>>, %arg25: memref<16x64xf32, #tpu.memory_space<vmem>>, %arg26: memref<4x320xbf16, #tpu.memory_space<vmem>>, %arg27: memref<4x64xf32, #tpu.memory_space<vmem>>, %arg28: memref<2x128xbf16, #tpu.memory_space<vmem>>) attributes {dimension_semantics = [], scalar_prefetch = 0 : i64, scratch_operands = 6 : i64, tpu.core_type = #tpu.core_type<tc>} {
    %c0 = arith.constant 0 : index
    %c0_0 = arith.constant 0 : index
    %0 = vector.load %arg0[%c0, %c0_0] : memref<16x320xbf16, #tpu.memory_space<vmem>>, vector<16x320xbf16>
    %c0_1 = arith.constant 0 : index
    %c0_2 = arith.constant 0 : index
    %1 = vector.load %arg1[%c0_1, %c0_2] : memref<320x64xbf16, #tpu.memory_space<vmem>>, vector<320x64xbf16>
    %cst = arith.constant dense<0.000000e+00> : vector<16x64xf32>
    %2 = tpu.matmul %0, %1, %cst {dimension_numbers = #tpu.dot_dimension_numbers<[1], [0], [0], [1], [0, 0, 1, 1], [], []>} : vector<16x320xbf16>, vector<320x64xbf16>, vector<16x64xf32> -> vector<16x64xf32>
    %c0_3 = arith.constant 0 : index
    %c0_4 = arith.constant 0 : index
    %3 = vector.load %arg2[%c0_3, %c0_4] : memref<64x8xf32, #tpu.memory_space<vmem>>, vector<64x8xf32>
    %c0_5 = arith.constant 0 : index
    %c0_6 = arith.constant 0 : index
    %4 = vector.load %arg3[%c0_5, %c0_6] : memref<8x64xf32, #tpu.memory_space<vmem>>, vector<8x64xf32>
    %cst_7 = arith.constant dense<0.000000e+00> : vector<64xf32>
    %5 = vector.multi_reduction <add>, %2, %cst_7 [0] : vector<16x64xf32> to vector<64xf32>
    %6 = vector.shape_cast %5 : vector<64xf32> to vector<1x64xf32>
    %cst_8 = arith.constant dense<0.000000e+00> : vector<1x8xf32>
    %7 = tpu.matmul %6, %3, %cst_8 {dimension_numbers = #tpu.dot_dimension_numbers<[1], [0], [0], [1], [0, 0, 1, 1], [], []>} : vector<1x64xf32>, vector<64x8xf32>, vector<1x8xf32> -> vector<1x8xf32>
    %cst_9 = arith.constant 7.812500e-03 : f32
    %8 = vector.broadcast %cst_9 : f32 to vector<1x8xf32>
    %9 = arith.mulf %7, %8 : vector<1x8xf32>
    %cst_10 = arith.constant dense<0.000000e+00> : vector<1x64xf32>
    %10 = tpu.matmul %9, %4, %cst_10 {dimension_numbers = #tpu.dot_dimension_numbers<[1], [0], [0], [1], [0, 0, 1, 1], [], []>} : vector<1x8xf32>, vector<8x64xf32>, vector<1x64xf32> -> vector<1x64xf32>
    %11 = vector.broadcast %10 : vector<1x64xf32> to vector<16x64xf32>
    %12 = arith.subf %2, %11 : vector<16x64xf32>
    %13 = arith.mulf %12, %12 : vector<16x64xf32>
    %cst_11 = arith.constant dense<0.000000e+00> : vector<64xf32>
    %14 = vector.multi_reduction <add>, %13, %cst_11 [0] : vector<16x64xf32> to vector<64xf32>
    %15 = vector.shape_cast %14 : vector<64xf32> to vector<1x64xf32>
    %cst_12 = arith.constant dense<0.000000e+00> : vector<1x8xf32>
    %16 = tpu.matmul %15, %3, %cst_12 {dimension_numbers = #tpu.dot_dimension_numbers<[1], [0], [0], [1], [0, 0, 1, 1], [], []>} : vector<1x64xf32>, vector<64x8xf32>, vector<1x8xf32> -> vector<1x8xf32>
    %cst_13 = arith.constant 7.812500e-03 : f32
    %17 = vector.broadcast %cst_13 : f32 to vector<1x8xf32>
    %18 = arith.mulf %16, %17 : vector<1x8xf32>
    %c0_14 = arith.constant 0 : index
    %c0_15 = arith.constant 0 : index
    %19 = vector.load %arg4[%c0_14, %c0_15] : memref<1x8xf32, #tpu.memory_space<vmem>>, vector<1x8xf32>
    %cst_16 = arith.constant 9.99999974E-6 : f32
    %20 = vector.broadcast %cst_16 : f32 to vector<1x8xf32>
    %21 = arith.addf %18, %20 : vector<1x8xf32>
    %22 = math.rsqrt %21 : vector<1x8xf32>
    %23 = arith.mulf %19, %22 : vector<1x8xf32>
    %cst_17 = arith.constant dense<0.000000e+00> : vector<1x64xf32>
    %24 = tpu.matmul %23, %4, %cst_17 {dimension_numbers = #tpu.dot_dimension_numbers<[1], [0], [0], [1], [0, 0, 1, 1], [], []>} : vector<1x8xf32>, vector<8x64xf32>, vector<1x64xf32> -> vector<1x64xf32>
    %25 = vector.broadcast %24 : vector<1x64xf32> to vector<16x64xf32>
    %26 = arith.mulf %12, %25 : vector<16x64xf32>
    %c0_18 = arith.constant 0 : index
    %c0_19 = arith.constant 0 : index
    %27 = vector.load %arg5[%c0_18, %c0_19] : memref<1x64xf32, #tpu.memory_space<vmem>>, vector<1x64xf32>
    %28 = vector.broadcast %27 : vector<1x64xf32> to vector<16x64xf32>
    %29 = arith.addf %26, %28 : vector<16x64xf32>
    %cst_20 = arith.constant 0.000000e+00 : f32
    %30 = vector.broadcast %cst_20 : f32 to vector<16x64xf32>
    %31 = arith.maximumf %29, %30 : vector<16x64xf32>
    %cst_21 = arith.constant 0.000000e+00 : f32
    %32 = vector.broadcast %cst_21 : f32 to vector<24x64xf32>
    %c0_22 = arith.constant 0 : index
    %c0_23 = arith.constant 0 : index
    %33 = vector.load %arg23[%c0_22, %c0_23] : memref<24x64xf32, #tpu.memory_space<vmem>>, vector<24x64xf32>
    tpu.vector_store %arg23[%c0_22, %c0_23], %32 {strides = array<i32>} : memref<24x64xf32, #tpu.memory_space<vmem>>, vector<24x64xf32>,
    %34 = vector.extract_strided_slice %31 {offsets = [0, 0], sizes = [8, 64], strides = [1, 1]} : vector<16x64xf32> to vector<8x64xf32>
    %c2 = arith.constant 2 : index
    %c0_24 = arith.constant 0 : index
    %35 = vector.load %arg23[%c2, %c0_24] : memref<24x64xf32, #tpu.memory_space<vmem>>, vector<8x64xf32>
    tpu.vector_store %arg23[%c2, %c0_24], %34 {strides = array<i32>} : memref<24x64xf32, #tpu.memory_space<vmem>>, vector<8x64xf32>,
    %36 = vector.extract_strided_slice %31 {offsets = [8, 0], sizes = [8, 64], strides = [1, 1]} : vector<16x64xf32> to vector<8x64xf32>
    %c14 = arith.constant 14 : index
    %c0_25 = arith.constant 0 : index
    %37 = vector.load %arg23[%c14, %c0_25] : memref<24x64xf32, #tpu.memory_space<vmem>>, vector<8x64xf32>
    tpu.vector_store %arg23[%c14, %c0_25], %36 {strides = array<i32>} : memref<24x64xf32, #tpu.memory_space<vmem>>, vector<8x64xf32>,
    %c0_26 = arith.constant 0 : index
    %c0_27 = arith.constant 0 : index
    %38 = tpu.strided_load %arg23[%c0_26, %c0_27] {strides = array<i32: 2, 1>} : memref<24x64xf32, #tpu.memory_space<vmem>>, vector<4x64xf32>
    %39 = arith.truncf %38 : vector<4x64xf32> to vector<4x64xbf16>
    %c0_28 = arith.constant 0 : index
    %c0_29 = arith.constant 0 : index
    %40 = vector.load %arg24[%c0_28, %c0_29] : memref<8x320xbf16, #tpu.memory_space<vmem>>, vector<4x64xbf16>
    tpu.vector_store %arg24[%c0_28, %c0_29], %39 {strides = array<i32>} : memref<8x320xbf16, #tpu.memory_space<vmem>>, vector<4x64xbf16>,
    %c1 = arith.constant 1 : index
    %c0_30 = arith.constant 0 : index
    %41 = tpu.strided_load %arg23[%c1, %c0_30] {strides = array<i32: 2, 1>} : memref<24x64xf32, #tpu.memory_space<vmem>>, vector<4x64xf32>
    %42 = arith.truncf %41 : vector<4x64xf32> to vector<4x64xbf16>
    %c0_31 = arith.constant 0 : index
    %c64 = arith.constant 64 : index
    %43 = vector.load %arg24[%c0_31, %c64] : memref<8x320xbf16, #tpu.memory_space<vmem>>, vector<4x64xbf16>
    tpu.vector_store %arg24[%c0_31, %c64], %42 {strides = array<i32>} : memref<8x320xbf16, #tpu.memory_space<vmem>>, vector<4x64xbf16>,
    %c2_32 = arith.constant 2 : index
    %c0_33 = arith.constant 0 : index
    %44 = tpu.strided_load %arg23[%c2_32, %c0_33] {strides = array<i32: 2, 1>} : memref<24x64xf32, #tpu.memory_space<vmem>>, vector<4x64xf32>
    %45 = arith.truncf %44 : vector<4x64xf32> to vector<4x64xbf16>
    %c0_34 = arith.constant 0 : index
    %c128 = arith.constant 128 : index
    %46 = vector.load %arg24[%c0_34, %c128] : memref<8x320xbf16, #tpu.memory_space<vmem>>, vector<4x64xbf16>
    tpu.vector_store %arg24[%c0_34, %c128], %45 {strides = array<i32>} : memref<8x320xbf16, #tpu.memory_space<vmem>>, vector<4x64xbf16>,
    %c3 = arith.constant 3 : index
    %c0_35 = arith.constant 0 : index
    %47 = tpu.strided_load %arg23[%c3, %c0_35] {strides = array<i32: 2, 1>} : memref<24x64xf32, #tpu.memory_space<vmem>>, vector<4x64xf32>
    %48 = arith.truncf %47 : vector<4x64xf32> to vector<4x64xbf16>
    %c0_36 = arith.constant 0 : index
    %c192 = arith.constant 192 : index
    %49 = vector.load %arg24[%c0_36, %c192] : memref<8x320xbf16, #tpu.memory_space<vmem>>, vector<4x64xbf16>
    tpu.vector_store %arg24[%c0_36, %c192], %48 {strides = array<i32>} : memref<8x320xbf16, #tpu.memory_space<vmem>>, vector<4x64xbf16>,
    %c4 = arith.constant 4 : index
    %c0_37 = arith.constant 0 : index
    %50 = tpu.strided_load %arg23[%c4, %c0_37] {strides = array<i32: 2, 1>} : memref<24x64xf32, #tpu.memory_space<vmem>>, vector<4x64xf32>
    %51 = arith.truncf %50 : vector<4x64xf32> to vector<4x64xbf16>
    %c0_38 = arith.constant 0 : index
    %c256 = arith.constant 256 : index
    %52 = vector.load %arg24[%c0_38, %c256] : memref<8x320xbf16, #tpu.memory_space<vmem>>, vector<4x64xbf16>
    tpu.vector_store %arg24[%c0_38, %c256], %51 {strides = array<i32>} : memref<8x320xbf16, #tpu.memory_space<vmem>>, vector<4x64xbf16>,
    %c12 = arith.constant 12 : index
    %c0_39 = arith.constant 0 : index
    %53 = tpu.strided_load %arg23[%c12, %c0_39] {strides = array<i32: 2, 1>} : memref<24x64xf32, #tpu.memory_space<vmem>>, vector<4x64xf32>
    %54 = arith.truncf %53 : vector<4x64xf32> to vector<4x64xbf16>
    %c4_40 = arith.constant 4 : index
    %c0_41 = arith.constant 0 : index
    %55 = vector.load %arg24[%c4_40, %c0_41] : memref<8x320xbf16, #tpu.memory_space<vmem>>, vector<4x64xbf16>
    tpu.vector_store %arg24[%c4_40, %c0_41], %54 {strides = array<i32>} : memref<8x320xbf16, #tpu.memory_space<vmem>>, vector<4x64xbf16>,
    %c13 = arith.constant 13 : index
    %c0_42 = arith.constant 0 : index
    %56 = tpu.strided_load %arg23[%c13, %c0_42] {strides = array<i32: 2, 1>} : memref<24x64xf32, #tpu.memory_space<vmem>>, vector<4x64xf32>
    %57 = arith.truncf %56 : vector<4x64xf32> to vector<4x64xbf16>
    %c4_43 = arith.constant 4 : index
    %c64_44 = arith.constant 64 : index
    %58 = vector.load %arg24[%c4_43, %c64_44] : memref<8x320xbf16, #tpu.memory_space<vmem>>, vector<4x64xbf16>
    tpu.vector_store %arg24[%c4_43, %c64_44], %57 {strides = array<i32>} : memref<8x320xbf16, #tpu.memory_space<vmem>>, vector<4x64xbf16>,
    %c14_45 = arith.constant 14 : index
    %c0_46 = arith.constant 0 : index
    %59 = tpu.strided_load %arg23[%c14_45, %c0_46] {strides = array<i32: 2, 1>} : memref<24x64xf32, #tpu.memory_space<vmem>>, vector<4x64xf32>
    %60 = arith.truncf %59 : vector<4x64xf32> to vector<4x64xbf16>
    %c4_47 = arith.constant 4 : index
    %c128_48 = arith.constant 128 : index
    %61 = vector.load %arg24[%c4_47, %c128_48] : memref<8x320xbf16, #tpu.memory_space<vmem>>, vector<4x64xbf16>
    tpu.vector_store %arg24[%c4_47, %c128_48], %60 {strides = array<i32>} : memref<8x320xbf16, #tpu.memory_space<vmem>>, vector<4x64xbf16>,
    %c15 = arith.constant 15 : index
    %c0_49 = arith.constant 0 : index
    %62 = tpu.strided_load %arg23[%c15, %c0_49] {strides = array<i32: 2, 1>} : memref<24x64xf32, #tpu.memory_space<vmem>>, vector<4x64xf32>
    %63 = arith.truncf %62 : vector<4x64xf32> to vector<4x64xbf16>
    %c4_50 = arith.constant 4 : index
    %c192_51 = arith.constant 192 : index
    %64 = vector.load %arg24[%c4_50, %c192_51] : memref<8x320xbf16, #tpu.memory_space<vmem>>, vector<4x64xbf16>
    tpu.vector_store %arg24[%c4_50, %c192_51], %63 {strides = array<i32>} : memref<8x320xbf16, #tpu.memory_space<vmem>>, vector<4x64xbf16>,
    %c16 = arith.constant 16 : index
    %c0_52 = arith.constant 0 : index
    %65 = tpu.strided_load %arg23[%c16, %c0_52] {strides = array<i32: 2, 1>} : memref<24x64xf32, #tpu.memory_space<vmem>>, vector<4x64xf32>
    %66 = arith.truncf %65 : vector<4x64xf32> to vector<4x64xbf16>
    %c4_53 = arith.constant 4 : index
    %c256_54 = arith.constant 256 : index
    %67 = vector.load %arg24[%c4_53, %c256_54] : memref<8x320xbf16, #tpu.memory_space<vmem>>, vector<4x64xbf16>
    tpu.vector_store %arg24[%c4_53, %c256_54], %66 {strides = array<i32>} : memref<8x320xbf16, #tpu.memory_space<vmem>>, vector<4x64xbf16>,
    %c0_55 = arith.constant 0 : index
    %c0_56 = arith.constant 0 : index
    %68 = vector.load %arg24[%c0_55, %c0_56] : memref<8x320xbf16, #tpu.memory_space<vmem>>, vector<8x320xbf16>
    %c0_57 = arith.constant 0 : index
    %c0_58 = arith.constant 0 : index
    %69 = vector.load %arg6[%c0_57, %c0_58] : memref<320x64xbf16, #tpu.memory_space<vmem>>, vector<320x64xbf16>
    %cst_59 = arith.constant dense<0.000000e+00> : vector<8x64xf32>
    %70 = tpu.matmul %68, %69, %cst_59 {dimension_numbers = #tpu.dot_dimension_numbers<[1], [0], [0], [1], [0, 0, 1, 1], [], []>} : vector<8x320xbf16>, vector<320x64xbf16>, vector<8x64xf32> -> vector<8x64xf32>
    %c0_60 = arith.constant 0 : index
    %c0_61 = arith.constant 0 : index
    %71 = vector.load %arg7[%c0_60, %c0_61] : memref<64x16xf32, #tpu.memory_space<vmem>>, vector<64x16xf32>
    %c0_62 = arith.constant 0 : index
    %c0_63 = arith.constant 0 : index
    %72 = vector.load %arg8[%c0_62, %c0_63] : memref<16x64xf32, #tpu.memory_space<vmem>>, vector<16x64xf32>
    %cst_64 = arith.constant dense<0.000000e+00> : vector<64xf32>
    %73 = vector.multi_reduction <add>, %70, %cst_64 [0] : vector<8x64xf32> to vector<64xf32>
    %74 = vector.shape_cast %73 : vector<64xf32> to vector<1x64xf32>
    %cst_65 = arith.constant dense<0.000000e+00> : vector<1x16xf32>
    %75 = tpu.matmul %74, %71, %cst_65 {dimension_numbers = #tpu.dot_dimension_numbers<[1], [0], [0], [1], [0, 0, 1, 1], [], []>} : vector<1x64xf32>, vector<64x16xf32>, vector<1x16xf32> -> vector<1x16xf32>
    %cst_66 = arith.constant 3.125000e-02 : f32
    %76 = vector.broadcast %cst_66 : f32 to vector<1x16xf32>
    %77 = arith.mulf %75, %76 : vector<1x16xf32>
    %cst_67 = arith.constant dense<0.000000e+00> : vector<1x64xf32>
    %78 = tpu.matmul %77, %72, %cst_67 {dimension_numbers = #tpu.dot_dimension_numbers<[1], [0], [0], [1], [0, 0, 1, 1], [], []>} : vector<1x16xf32>, vector<16x64xf32>, vector<1x64xf32> -> vector<1x64xf32>
    %79 = vector.broadcast %78 : vector<1x64xf32> to vector<8x64xf32>
    %80 = arith.subf %70, %79 : vector<8x64xf32>
    %81 = arith.mulf %80, %80 : vector<8x64xf32>
    %cst_68 = arith.constant dense<0.000000e+00> : vector<64xf32>
    %82 = vector.multi_reduction <add>, %81, %cst_68 [0] : vector<8x64xf32> to vector<64xf32>
    %83 = vector.shape_cast %82 : vector<64xf32> to vector<1x64xf32>
    %cst_69 = arith.constant dense<0.000000e+00> : vector<1x16xf32>
    %84 = tpu.matmul %83, %71, %cst_69 {dimension_numbers = #tpu.dot_dimension_numbers<[1], [0], [0], [1], [0, 0, 1, 1], [], []>} : vector<1x64xf32>, vector<64x16xf32>, vector<1x16xf32> -> vector<1x16xf32>
    %cst_70 = arith.constant 3.125000e-02 : f32
    %85 = vector.broadcast %cst_70 : f32 to vector<1x16xf32>
    %86 = arith.mulf %84, %85 : vector<1x16xf32>
    %c0_71 = arith.constant 0 : index
    %c0_72 = arith.constant 0 : index
    %87 = vector.load %arg9[%c0_71, %c0_72] : memref<1x16xf32, #tpu.memory_space<vmem>>, vector<1x16xf32>
    %cst_73 = arith.constant 9.99999974E-6 : f32
    %88 = vector.broadcast %cst_73 : f32 to vector<1x16xf32>
    %89 = arith.addf %86, %88 : vector<1x16xf32>
    %90 = math.rsqrt %89 : vector<1x16xf32>
    %91 = arith.mulf %87, %90 : vector<1x16xf32>
    %cst_74 = arith.constant dense<0.000000e+00> : vector<1x64xf32>
    %92 = tpu.matmul %91, %72, %cst_74 {dimension_numbers = #tpu.dot_dimension_numbers<[1], [0], [0], [1], [0, 0, 1, 1], [], []>} : vector<1x16xf32>, vector<16x64xf32>, vector<1x64xf32> -> vector<1x64xf32>
    %93 = vector.broadcast %92 : vector<1x64xf32> to vector<8x64xf32>
    %94 = arith.mulf %80, %93 : vector<8x64xf32>
    %c0_75 = arith.constant 0 : index
    %c0_76 = arith.constant 0 : index
    %95 = vector.load %arg10[%c0_75, %c0_76] : memref<1x64xf32, #tpu.memory_space<vmem>>, vector<1x64xf32>
    %96 = vector.broadcast %95 : vector<1x64xf32> to vector<8x64xf32>
    %97 = arith.addf %94, %96 : vector<8x64xf32>
    %cst_77 = arith.constant 0.000000e+00 : f32
    %98 = vector.broadcast %cst_77 : f32 to vector<8x64xf32>
    %99 = arith.maximumf %97, %98 : vector<8x64xf32>
    %cst_78 = arith.constant 0.000000e+00 : f32
    %100 = vector.broadcast %cst_78 : f32 to vector<16x64xf32>
    %c0_79 = arith.constant 0 : index
    %c0_80 = arith.constant 0 : index
    %101 = vector.load %arg25[%c0_79, %c0_80] : memref<16x64xf32, #tpu.memory_space<vmem>>, vector<16x64xf32>
    tpu.vector_store %arg25[%c0_79, %c0_80], %100 {strides = array<i32>} : memref<16x64xf32, #tpu.memory_space<vmem>>, vector<16x64xf32>,
    %102 = vector.extract_strided_slice %99 {offsets = [0, 0], sizes = [4, 64], strides = [1, 1]} : vector<8x64xf32> to vector<4x64xf32>
    %c2_81 = arith.constant 2 : index
    %c0_82 = arith.constant 0 : index
    %103 = vector.load %arg25[%c2_81, %c0_82] : memref<16x64xf32, #tpu.memory_space<vmem>>, vector<4x64xf32>
    tpu.vector_store %arg25[%c2_81, %c0_82], %102 {strides = array<i32>} : memref<16x64xf32, #tpu.memory_space<vmem>>, vector<4x64xf32>,
    %104 = vector.extract_strided_slice %99 {offsets = [4, 0], sizes = [4, 64], strides = [1, 1]} : vector<8x64xf32> to vector<4x64xf32>
    %c10 = arith.constant 10 : index
    %c0_83 = arith.constant 0 : index
    %105 = vector.load %arg25[%c10, %c0_83] : memref<16x64xf32, #tpu.memory_space<vmem>>, vector<4x64xf32>
    tpu.vector_store %arg25[%c10, %c0_83], %104 {strides = array<i32>} : memref<16x64xf32, #tpu.memory_space<vmem>>, vector<4x64xf32>,
    %c0_84 = arith.constant 0 : index
    %c0_85 = arith.constant 0 : index
    %106 = tpu.strided_load %arg25[%c0_84, %c0_85] {strides = array<i32: 2, 1>} : memref<16x64xf32, #tpu.memory_space<vmem>>, vector<2x64xf32>
    %107 = arith.truncf %106 : vector<2x64xf32> to vector<2x64xbf16>
    %c0_86 = arith.constant 0 : index
    %c0_87 = arith.constant 0 : index
    %108 = vector.load %arg26[%c0_86, %c0_87] : memref<4x320xbf16, #tpu.memory_space<vmem>>, vector<2x64xbf16>
    tpu.vector_store %arg26[%c0_86, %c0_87], %107 {strides = array<i32>} : memref<4x320xbf16, #tpu.memory_space<vmem>>, vector<2x64xbf16>,
    %c1_88 = arith.constant 1 : index
    %c0_89 = arith.constant 0 : index
    %109 = tpu.strided_load %arg25[%c1_88, %c0_89] {strides = array<i32: 2, 1>} : memref<16x64xf32, #tpu.memory_space<vmem>>, vector<2x64xf32>
    %110 = arith.truncf %109 : vector<2x64xf32> to vector<2x64xbf16>
    %c0_90 = arith.constant 0 : index
    %c64_91 = arith.constant 64 : index
    %111 = vector.load %arg26[%c0_90, %c64_91] : memref<4x320xbf16, #tpu.memory_space<vmem>>, vector<2x64xbf16>
    tpu.vector_store %arg26[%c0_90, %c64_91], %110 {strides = array<i32>} : memref<4x320xbf16, #tpu.memory_space<vmem>>, vector<2x64xbf16>,
    %c2_92 = arith.constant 2 : index
    %c0_93 = arith.constant 0 : index
    %112 = tpu.strided_load %arg25[%c2_92, %c0_93] {strides = array<i32: 2, 1>} : memref<16x64xf32, #tpu.memory_space<vmem>>, vector<2x64xf32>
    %113 = arith.truncf %112 : vector<2x64xf32> to vector<2x64xbf16>
    %c0_94 = arith.constant 0 : index
    %c128_95 = arith.constant 128 : index
    %114 = vector.load %arg26[%c0_94, %c128_95] : memref<4x320xbf16, #tpu.memory_space<vmem>>, vector<2x64xbf16>
    tpu.vector_store %arg26[%c0_94, %c128_95], %113 {strides = array<i32>} : memref<4x320xbf16, #tpu.memory_space<vmem>>, vector<2x64xbf16>,
    %c3_96 = arith.constant 3 : index
    %c0_97 = arith.constant 0 : index
    %115 = tpu.strided_load %arg25[%c3_96, %c0_97] {strides = array<i32: 2, 1>} : memref<16x64xf32, #tpu.memory_space<vmem>>, vector<2x64xf32>
    %116 = arith.truncf %115 : vector<2x64xf32> to vector<2x64xbf16>
    %c0_98 = arith.constant 0 : index
    %c192_99 = arith.constant 192 : index
    %117 = vector.load %arg26[%c0_98, %c192_99] : memref<4x320xbf16, #tpu.memory_space<vmem>>, vector<2x64xbf16>
    tpu.vector_store %arg26[%c0_98, %c192_99], %116 {strides = array<i32>} : memref<4x320xbf16, #tpu.memory_space<vmem>>, vector<2x64xbf16>,
    %c4_100 = arith.constant 4 : index
    %c0_101 = arith.constant 0 : index
    %118 = tpu.strided_load %arg25[%c4_100, %c0_101] {strides = array<i32: 2, 1>} : memref<16x64xf32, #tpu.memory_space<vmem>>, vector<2x64xf32>
    %119 = arith.truncf %118 : vector<2x64xf32> to vector<2x64xbf16>
    %c0_102 = arith.constant 0 : index
    %c256_103 = arith.constant 256 : index
    %120 = vector.load %arg26[%c0_102, %c256_103] : memref<4x320xbf16, #tpu.memory_space<vmem>>, vector<2x64xbf16>
    tpu.vector_store %arg26[%c0_102, %c256_103], %119 {strides = array<i32>} : memref<4x320xbf16, #tpu.memory_space<vmem>>, vector<2x64xbf16>,
    %c8 = arith.constant 8 : index
    %c0_104 = arith.constant 0 : index
    %121 = tpu.strided_load %arg25[%c8, %c0_104] {strides = array<i32: 2, 1>} : memref<16x64xf32, #tpu.memory_space<vmem>>, vector<2x64xf32>
    %122 = arith.truncf %121 : vector<2x64xf32> to vector<2x64xbf16>
    %c2_105 = arith.constant 2 : index
    %c0_106 = arith.constant 0 : index
    %123 = vector.load %arg26[%c2_105, %c0_106] : memref<4x320xbf16, #tpu.memory_space<vmem>>, vector<2x64xbf16>
    tpu.vector_store %arg26[%c2_105, %c0_106], %122 {strides = array<i32>} : memref<4x320xbf16, #tpu.memory_space<vmem>>, vector<2x64xbf16>,
    %c9 = arith.constant 9 : index
    %c0_107 = arith.constant 0 : index
    %124 = tpu.strided_load %arg25[%c9, %c0_107] {strides = array<i32: 2, 1>} : memref<16x64xf32, #tpu.memory_space<vmem>>, vector<2x64xf32>
    %125 = arith.truncf %124 : vector<2x64xf32> to vector<2x64xbf16>
    %c2_108 = arith.constant 2 : index
    %c64_109 = arith.constant 64 : index
    %126 = vector.load %arg26[%c2_108, %c64_109] : memref<4x320xbf16, #tpu.memory_space<vmem>>, vector<2x64xbf16>
    tpu.vector_store %arg26[%c2_108, %c64_109], %125 {strides = array<i32>} : memref<4x320xbf16, #tpu.memory_space<vmem>>, vector<2x64xbf16>,
    %c10_110 = arith.constant 10 : index
    %c0_111 = arith.constant 0 : index
    %127 = tpu.strided_load %arg25[%c10_110, %c0_111] {strides = array<i32: 2, 1>} : memref<16x64xf32, #tpu.memory_space<vmem>>, vector<2x64xf32>
    %128 = arith.truncf %127 : vector<2x64xf32> to vector<2x64xbf16>
    %c2_112 = arith.constant 2 : index
    %c128_113 = arith.constant 128 : index
    %129 = vector.load %arg26[%c2_112, %c128_113] : memref<4x320xbf16, #tpu.memory_space<vmem>>, vector<2x64xbf16>
    tpu.vector_store %arg26[%c2_112, %c128_113], %128 {strides = array<i32>} : memref<4x320xbf16, #tpu.memory_space<vmem>>, vector<2x64xbf16>,
    %c11 = arith.constant 11 : index
    %c0_114 = arith.constant 0 : index
    %130 = tpu.strided_load %arg25[%c11, %c0_114] {strides = array<i32: 2, 1>} : memref<16x64xf32, #tpu.memory_space<vmem>>, vector<2x64xf32>
    %131 = arith.truncf %130 : vector<2x64xf32> to vector<2x64xbf16>
    %c2_115 = arith.constant 2 : index
    %c192_116 = arith.constant 192 : index
    %132 = vector.load %arg26[%c2_115, %c192_116] : memref<4x320xbf16, #tpu.memory_space<vmem>>, vector<2x64xbf16>
    tpu.vector_store %arg26[%c2_115, %c192_116], %131 {strides = array<i32>} : memref<4x320xbf16, #tpu.memory_space<vmem>>, vector<2x64xbf16>,
    %c12_117 = arith.constant 12 : index
    %c0_118 = arith.constant 0 : index
    %133 = tpu.strided_load %arg25[%c12_117, %c0_118] {strides = array<i32: 2, 1>} : memref<16x64xf32, #tpu.memory_space<vmem>>, vector<2x64xf32>
    %134 = arith.truncf %133 : vector<2x64xf32> to vector<2x64xbf16>
    %c2_119 = arith.constant 2 : index
    %c256_120 = arith.constant 256 : index
    %135 = vector.load %arg26[%c2_119, %c256_120] : memref<4x320xbf16, #tpu.memory_space<vmem>>, vector<2x64xbf16>
    tpu.vector_store %arg26[%c2_119, %c256_120], %134 {strides = array<i32>} : memref<4x320xbf16, #tpu.memory_space<vmem>>, vector<2x64xbf16>,
    %c0_121 = arith.constant 0 : index
    %c0_122 = arith.constant 0 : index
    %136 = vector.load %arg26[%c0_121, %c0_122] : memref<4x320xbf16, #tpu.memory_space<vmem>>, vector<4x320xbf16>
    %c0_123 = arith.constant 0 : index
    %c0_124 = arith.constant 0 : index
    %137 = vector.load %arg11[%c0_123, %c0_124] : memref<320x64xbf16, #tpu.memory_space<vmem>>, vector<320x64xbf16>
    %cst_125 = arith.constant dense<0.000000e+00> : vector<4x64xf32>
    %138 = tpu.matmul %136, %137, %cst_125 {dimension_numbers = #tpu.dot_dimension_numbers<[1], [0], [0], [1], [0, 0, 1, 1], [], []>} : vector<4x320xbf16>, vector<320x64xbf16>, vector<4x64xf32> -> vector<4x64xf32>
    %c0_126 = arith.constant 0 : index
    %c0_127 = arith.constant 0 : index
    %139 = vector.load %arg12[%c0_126, %c0_127] : memref<64x32xf32, #tpu.memory_space<vmem>>, vector<64x32xf32>
    %c0_128 = arith.constant 0 : index
    %c0_129 = arith.constant 0 : index
    %140 = vector.load %arg13[%c0_128, %c0_129] : memref<32x64xf32, #tpu.memory_space<vmem>>, vector<32x64xf32>
    %cst_130 = arith.constant dense<0.000000e+00> : vector<64xf32>
    %141 = vector.multi_reduction <add>, %138, %cst_130 [0] : vector<4x64xf32> to vector<64xf32>
    %142 = vector.shape_cast %141 : vector<64xf32> to vector<1x64xf32>
    %cst_131 = arith.constant dense<0.000000e+00> : vector<1x32xf32>
    %143 = tpu.matmul %142, %139, %cst_131 {dimension_numbers = #tpu.dot_dimension_numbers<[1], [0], [0], [1], [0, 0, 1, 1], [], []>} : vector<1x64xf32>, vector<64x32xf32>, vector<1x32xf32> -> vector<1x32xf32>
    %cst_132 = arith.constant 1.250000e-01 : f32
    %144 = vector.broadcast %cst_132 : f32 to vector<1x32xf32>
    %145 = arith.mulf %143, %144 : vector<1x32xf32>
    %cst_133 = arith.constant dense<0.000000e+00> : vector<1x64xf32>
    %146 = tpu.matmul %145, %140, %cst_133 {dimension_numbers = #tpu.dot_dimension_numbers<[1], [0], [0], [1], [0, 0, 1, 1], [], []>} : vector<1x32xf32>, vector<32x64xf32>, vector<1x64xf32> -> vector<1x64xf32>
    %147 = vector.broadcast %146 : vector<1x64xf32> to vector<4x64xf32>
    %148 = arith.subf %138, %147 : vector<4x64xf32>
    %149 = arith.mulf %148, %148 : vector<4x64xf32>
    %cst_134 = arith.constant dense<0.000000e+00> : vector<64xf32>
    %150 = vector.multi_reduction <add>, %149, %cst_134 [0] : vector<4x64xf32> to vector<64xf32>
    %151 = vector.shape_cast %150 : vector<64xf32> to vector<1x64xf32>
    %cst_135 = arith.constant dense<0.000000e+00> : vector<1x32xf32>
    %152 = tpu.matmul %151, %139, %cst_135 {dimension_numbers = #tpu.dot_dimension_numbers<[1], [0], [0], [1], [0, 0, 1, 1], [], []>} : vector<1x64xf32>, vector<64x32xf32>, vector<1x32xf32> -> vector<1x32xf32>
    %cst_136 = arith.constant 1.250000e-01 : f32
    %153 = vector.broadcast %cst_136 : f32 to vector<1x32xf32>
    %154 = arith.mulf %152, %153 : vector<1x32xf32>
    %c0_137 = arith.constant 0 : index
    %c0_138 = arith.constant 0 : index
    %155 = vector.load %arg14[%c0_137, %c0_138] : memref<1x32xf32, #tpu.memory_space<vmem>>, vector<1x32xf32>
    %cst_139 = arith.constant 9.99999974E-6 : f32
    %156 = vector.broadcast %cst_139 : f32 to vector<1x32xf32>
    %157 = arith.addf %154, %156 : vector<1x32xf32>
    %158 = math.rsqrt %157 : vector<1x32xf32>
    %159 = arith.mulf %155, %158 : vector<1x32xf32>
    %cst_140 = arith.constant dense<0.000000e+00> : vector<1x64xf32>
    %160 = tpu.matmul %159, %140, %cst_140 {dimension_numbers = #tpu.dot_dimension_numbers<[1], [0], [0], [1], [0, 0, 1, 1], [], []>} : vector<1x32xf32>, vector<32x64xf32>, vector<1x64xf32> -> vector<1x64xf32>
    %161 = vector.broadcast %160 : vector<1x64xf32> to vector<4x64xf32>
    %162 = arith.mulf %148, %161 : vector<4x64xf32>
    %c0_141 = arith.constant 0 : index
    %c0_142 = arith.constant 0 : index
    %163 = vector.load %arg15[%c0_141, %c0_142] : memref<1x64xf32, #tpu.memory_space<vmem>>, vector<1x64xf32>
    %164 = vector.broadcast %163 : vector<1x64xf32> to vector<4x64xf32>
    %165 = arith.addf %162, %164 : vector<4x64xf32>
    %cst_143 = arith.constant 0.000000e+00 : f32
    %166 = vector.broadcast %cst_143 : f32 to vector<4x64xf32>
    %167 = arith.maximumf %165, %166 : vector<4x64xf32>
    %c0_144 = arith.constant 0 : index
    %c0_145 = arith.constant 0 : index
    %168 = vector.load %arg27[%c0_144, %c0_145] : memref<4x64xf32, #tpu.memory_space<vmem>>, vector<4x64xf32>
    tpu.vector_store %arg27[%c0_144, %c0_145], %167 {strides = array<i32>} : memref<4x64xf32, #tpu.memory_space<vmem>>, vector<4x64xf32>,
    %c0_146 = arith.constant 0 : index
    %c0_147 = arith.constant 0 : index
    %169 = tpu.strided_load %arg27[%c0_146, %c0_147] {strides = array<i32: 2, 1>} : memref<4x64xf32, #tpu.memory_space<vmem>>, vector<2x64xf32>
    %170 = arith.truncf %169 : vector<2x64xf32> to vector<2x64xbf16>
    %c0_148 = arith.constant 0 : index
    %c0_149 = arith.constant 0 : index
    %171 = vector.load %arg28[%c0_148, %c0_149] : memref<2x128xbf16, #tpu.memory_space<vmem>>, vector<2x64xbf16>
    tpu.vector_store %arg28[%c0_148, %c0_149], %170 {strides = array<i32>} : memref<2x128xbf16, #tpu.memory_space<vmem>>, vector<2x64xbf16>,
    %c1_150 = arith.constant 1 : index
    %c0_151 = arith.constant 0 : index
    %172 = tpu.strided_load %arg27[%c1_150, %c0_151] {strides = array<i32: 2, 1>} : memref<4x64xf32, #tpu.memory_space<vmem>>, vector<2x64xf32>
    %173 = arith.truncf %172 : vector<2x64xf32> to vector<2x64xbf16>
    %c0_152 = arith.constant 0 : index
    %c64_153 = arith.constant 64 : index
    %174 = vector.load %arg28[%c0_152, %c64_153] : memref<2x128xbf16, #tpu.memory_space<vmem>>, vector<2x64xbf16>
    tpu.vector_store %arg28[%c0_152, %c64_153], %173 {strides = array<i32>} : memref<2x128xbf16, #tpu.memory_space<vmem>>, vector<2x64xbf16>,
    %c0_154 = arith.constant 0 : index
    %c0_155 = arith.constant 0 : index
    %175 = vector.load %arg28[%c0_154, %c0_155] : memref<2x128xbf16, #tpu.memory_space<vmem>>, vector<2x128xbf16>
    %c0_156 = arith.constant 0 : index
    %c0_157 = arith.constant 0 : index
    %176 = vector.load %arg16[%c0_156, %c0_157] : memref<128x64xbf16, #tpu.memory_space<vmem>>, vector<128x64xbf16>
    %cst_158 = arith.constant dense<0.000000e+00> : vector<2x64xf32>
    %177 = tpu.matmul %175, %176, %cst_158 {dimension_numbers = #tpu.dot_dimension_numbers<[1], [0], [0], [1], [0, 0, 1, 1], [], []>} : vector<2x128xbf16>, vector<128x64xbf16>, vector<2x64xf32> -> vector<2x64xf32>
    %c0_159 = arith.constant 0 : index
    %c0_160 = arith.constant 0 : index
    %178 = vector.load %arg17[%c0_159, %c0_160] : memref<1x64xf32, #tpu.memory_space<vmem>>, vector<1x64xf32>
    %179 = vector.broadcast %178 : vector<1x64xf32> to vector<2x64xf32>
    %180 = arith.addf %177, %179 : vector<2x64xf32>
    %cst_161 = arith.constant 0.000000e+00 : f32
    %181 = vector.broadcast %cst_161 : f32 to vector<2x64xf32>
    %182 = arith.maximumf %180, %181 : vector<2x64xf32>
    %183 = arith.truncf %182 : vector<2x64xf32> to vector<2x64xbf16>
    %c0_162 = arith.constant 0 : index
    %c0_163 = arith.constant 0 : index
    %184 = vector.load %arg18[%c0_162, %c0_163] : memref<64x64xbf16, #tpu.memory_space<vmem>>, vector<64x64xbf16>
    %cst_164 = arith.constant dense<0.000000e+00> : vector<2x64xf32>
    %185 = tpu.matmul %183, %184, %cst_164 {dimension_numbers = #tpu.dot_dimension_numbers<[1], [0], [0], [1], [0, 0, 1, 1], [], []>} : vector<2x64xbf16>, vector<64x64xbf16>, vector<2x64xf32> -> vector<2x64xf32>
    %c0_165 = arith.constant 0 : index
    %c0_166 = arith.constant 0 : index
    %186 = vector.load %arg19[%c0_165, %c0_166] : memref<1x64xf32, #tpu.memory_space<vmem>>, vector<1x64xf32>
    %187 = vector.broadcast %186 : vector<1x64xf32> to vector<2x64xf32>
    %188 = arith.addf %185, %187 : vector<2x64xf32>
    %cst_167 = arith.constant 0.000000e+00 : f32
    %189 = vector.broadcast %cst_167 : f32 to vector<2x64xf32>
    %190 = arith.maximumf %188, %189 : vector<2x64xf32>
    %191 = arith.truncf %190 : vector<2x64xf32> to vector<2x64xbf16>
    %c0_168 = arith.constant 0 : index
    %c0_169 = arith.constant 0 : index
    %192 = vector.load %arg20[%c0_168, %c0_169] : memref<64x128xbf16, #tpu.memory_space<vmem>>, vector<64x128xbf16>
    %cst_170 = arith.constant dense<0.000000e+00> : vector<2x128xf32>
    %193 = tpu.matmul %191, %192, %cst_170 {dimension_numbers = #tpu.dot_dimension_numbers<[1], [0], [0], [1], [0, 0, 1, 1], [], []>} : vector<2x64xbf16>, vector<64x128xbf16>, vector<2x128xf32> -> vector<2x128xf32>
    %c0_171 = arith.constant 0 : index
    %c0_172 = arith.constant 0 : index
    %194 = vector.load %arg21[%c0_171, %c0_172] : memref<1x128xf32, #tpu.memory_space<vmem>>, vector<1x128xf32>
    %195 = vector.broadcast %194 : vector<1x128xf32> to vector<2x128xf32>
    %196 = arith.addf %193, %195 : vector<2x128xf32>
    %cst_173 = arith.constant 0.000000e+00 : f32
    %197 = vector.broadcast %cst_173 : f32 to vector<2x128xf32>
    %198 = arith.maximumf %196, %197 : vector<2x128xf32>
    %c0_174 = arith.constant 0 : index
    %c0_175 = arith.constant 0 : index
    %199 = vector.load %arg22[%c0_174, %c0_175] : memref<2x128xf32, #tpu.memory_space<vmem>>, vector<2x128xf32>
    tpu.vector_store %arg22[%c0_174, %c0_175], %198 {strides = array<i32>} : memref<2x128xf32, #tpu.memory_space<vmem>>, vector<2x128xf32>,
    return
  }
}

</mosaic_0001>

<bundles_post_ra>
// kernel: encoder_forward.1
= control target key start
LH: loop header
LB: loop body
LE: loop exit
PB: predicated region body
PF: predicated region fallthrough
CT: control target
= control target key end

     0   :  { %s3804_s0 = inlined_call_operand.vmem [shape: bf16[16,320], index: 0, kind: input, shape index: {}]   ;;  %s3805_s1 = inlined_call_operand.vmem [shape: bf16[320,64], index: 1, kind: input, shape index: {}]   ;;  %s3806_s2 = inlined_call_operand.vmem [shape: f32[64,8], index: 2, kind: input, shape index: {}]   ;;  %s3807_s3 = inlined_call_operand.vmem [shape: f32[8,64], index: 3, kind: input, shape index: {}]   ;;  %s3808_s4 = inlined_call_operand.vmem [shape: f32[1,8], index: 4, kind: input, shape index: {}]   ;;  %s3809_s5 = inlined_call_operand.vmem [shape: f32[1,64], index: 5, kind: input, shape index: {}]   ;;  %s3810_s6 = inlined_call_operand.vmem [shape: bf16[320,64], index: 6, kind: input, shape index: {}]   ;;  %s3811_s7 = inlined_call_operand.vmem [shape: f32[64,16], index: 7, kind: input, shape index: {}]   ;;  %s3812_s8 = inlined_call_operand.vmem [shape: f32[16,64], index: 8, kind: input, shape index: {}]   ;;  %s3813_s9 = inlined_call_operand.vmem [shape: f32[1,16], index: 9, kind: input, shape index: {}]   ;;  %s3814_s10 = inlined_call_operand.vmem [shape: f32[1,64], index: 10, kind: input, shape index: {}]   ;;  %s3815_s11 = inlined_call_operand.vmem [shape: bf16[320,64], index: 11, kind: input, shape index: {}]   ;;  %s3816_s12 = inlined_call_operand.vmem [shape: f32[64,32], index: 12, kind: input, shape index: {}]   ;;  %s3817_s13 = inlined_call_operand.vmem [shape: f32[32,64], index: 13, kind: input, shape index: {}]   ;;  %s3818_s14 = inlined_call_operand.vmem [shape: f32[1,32], index: 14, kind: input, shape index: {}]   ;;  %s3819_s15 = inlined_call_operand.vmem [shape: f32[1,64], index: 15, kind: input, shape index: {}]   ;;  %s3820_s16 = inlined_call_operand.vmem [shape: bf16[128,64], index: 16, kind: input, shape index: {}]   ;;  %s3821_s17 = inlined_call_operand.vmem [shape: f32[1,64], index: 17, kind: input, shape index: {}]   ;;  %s3822_s18 = inlined_call_operand.vmem [shape: bf16[64,64], index: 18, kind: input, shape index: {}]   ;;  %s3823_s19 = inlined_call_operand.vmem [shape: f32[1,64], index: 19, kind: input, shape index: {}]   ;;  %s3824_s20 = inlined_call_operand.vmem [shape: bf16[64,128], index: 20, kind: input, shape index: {}]   ;;  %s3825_s21 = inlined_call_operand.vmem [shape: f32[1,128], index: 21, kind: input, shape index: {}]   ;;  %s3826_s22 = inlined_call_operand.hbm [shape: f32[2,128], index: 22, kind: output, shape index: {}]  }
   0x1   :  { %3831 = sst [smem:[#allocation11_spill]] %s3804_s0 }
   0x2   :  { %3832 = sst [smem:[#allocation12_spill]] %s3805_s1 }
   0x3   :  { %3833 = sst [smem:[#allocation13_spill]] %s3806_s2 }
   0x4   :  { %3834 = sst [smem:[#allocation14_spill]] %s3807_s3 }
   0x5   :  { %3835 = sst [smem:[#allocation15_spill]] %s3808_s4 }
   0x6   :  { %3836 = sst [smem:[#allocation16_spill]] %s3809_s5 }
   0x7   :  { %3837 = sst [smem:[#allocation17_spill]] %s3810_s6 }
   0x8   :  { %s3838_s29 = sld [smem:[#allocation12_spill]]  ;;  %v3082_v2 = vmov 0.0   ;;  %vm3083_vm0 = vmmov 0   ;;  %vm252_vm1 = vcmask 523264  }
   0x9   :  { %2724 = vmatprep.subr.bf16.mxu1 %v3082_v2  ;;  %2732 = vmatprep.mubr.msk.bf16.mxu1 %vm3083_vm0, %v3082_v2  ;;  %689 = vst.msk [vmem:[#allocation2] sm:$0xff] %vm252_vm1, %v3082_v2  ;;  %690 = vst.msk [vmem:[#allocation2 + $0x8] sm:$0xff] %vm252_vm1, %v3082_v2  ;;  %s3839_s25 = sld [smem:[#allocation11_spill]] }
   0xa   :  { %691 = vst.msk [vmem:[#allocation2 + $0x10] sm:$0xff] %vm252_vm1, %v3082_v2  ;;  %1376 = vst.msk [vmem:[#allocation4] sm:$0xff] %vm252_vm1, %v3082_v2 }
   0xb   :  { %1377 = vst.msk [vmem:[#allocation4 + $0x8] sm:$0xff] %vm252_vm1, %v3082_v2 }
   0xe   :  { %v2970_v0 = vld [vmem:[%s3838_s29 + $0x78] sm:$0xff]   ;;  %v2972_v3 = vld [vmem:[%s3838_s29 + $0x70] sm:$0xff]   ;;  %v2974_v5 = vld [vmem:[%s3838_s29 + $0x68] sm:$0xff]  }
   0xf   :  { %v2971_v1 = vld [vmem:[%s3838_s29 + $0x38] sm:$0xff]   ;;  %2550 = vmatprep.subr.bf16.mxu0 %v2970_v0  ;;  %v2973_v4 = vld [vmem:[%s3838_s29 + $0x30] sm:$0xff]   ;;  %v2975_v6 = vld [vmem:[%s3838_s29 + $0x28] sm:$0xff]  }
  0x10   :  { %2551 = vmatpush3.bf16.msra.mxu0 %v2971_v1  ;;  %v2976_v7 = vld [vmem:[%s3838_s29 + $0x60] sm:$0xff]   ;;  %v2978_v8 = vld [vmem:[%s3838_s29 + $0x98] sm:$0xff]   ;;  %v2981_v10 = vld [vmem:[%s3838_s29 + $0x90] sm:$0xff]  }
  0x11   :  { %2552 = vmatprep.subr.bf16.mxu0 %v2972_v3  ;;  %v2977_v9 = vld [vmem:[%s3838_s29 + $0x20] sm:$0xff]   ;;  %2725 = vmatpush3.bf16.msra.mxu1 %v2978_v8  ;;  %v2979_v11 = vld [vmem:[%s3838_s29 + $0x58] sm:$0xff]   ;;  %v2984_v12 = vld [vmem:[%s3838_s29 + $0x88] sm:$0xff]  }
  0x12   :  { %2726 = vmatprep.subr.bf16.mxu1 %v3082_v2  ;;  %v2980_v13 = vld [vmem:[%s3838_s29 + $0x18] sm:$0xff]   ;;  %v2982_v14 = vld [vmem:[%s3838_s29 + $0x50] sm:$0xff]   ;;  %v2987_v15 = vld [vmem:[%s3838_s29 + $0x80] sm:$0xff]  }
  0x13   :  { %v2983_v16 = vld [vmem:[%s3838_s29 + $0x10] sm:$0xff]   ;;  %v2985_v17 = vld [vmem:[%s3838_s29 + $0x48] sm:$0xff]   ;;  %v2988_v20 = vld [vmem:[%s3838_s29 + $0x40] sm:$0xff]  }
  0x14   :  { %2553 = vmatpush3.bf16.msra.mxu0 %v2973_v4  ;;  %v2986_v18 = vld [vmem:[%s3838_s29 + $0x8] sm:$0xff]   ;;  %v2993_v21 = vld [vmem:[%s3839_s25 + $0x4] ss:$12 sps:$4 sm:$0xff]  }
  0x15   :  { %2554 = vmatprep.subr.bf16.mxu0 %v2974_v5  ;;  %2727 = vmatpush3.bf16.msra.mxu1 %v2981_v10  ;;  %v2990_v19 = vld [vmem:[%s3839_s25 + $0x8] ss:$12 sps:$4 sm:$0xff]   ;;  %v2989_v22 = vld [vmem:[%s3838_s29] sm:$0xff]  }
  0x16   :  { %2728 = vmatprep.subr.bf16.mxu1 %v3082_v2  ;;  %288 = vmatprep.mubr.bf16.mxu0 %v2993_v21  ;;  %v2991_v23 = vld [vmem:[%s3839_s25] ss:$12 sps:$4 sm:$0xff]  }
  0x18   :  { %2555 = vmatpush3.bf16.msra.mxu0 %v2975_v6 }
  0x19   :  { %2556 = vmatprep.subr.bf16.mxu0 %v2976_v7  ;;  %2729 = vmatpush3.bf16.msra.mxu1 %v2984_v12 }
  0x1a   :  { %2730 = vmatprep.subr.bf16.mxu1 %v3082_v2 }
  0x1c   :  { %2557 = vmatpush3.bf16.msra.mxu0 %v2977_v9 }
  0x1d   :  { %2558 = vmatprep.subr.bf16.mxu0 %v2979_v11  ;;  %2731 = vmatpush3.bf16.msra.mxu1 %v2987_v15 }
  0x1e   :  { %2736 = vmatprep.subr.mxu1 %v3082_v2 }
  0x20   :  { %2559 = vmatpush3.bf16.msra.mxu0 %v2980_v13  ;;  %2733 = vmatmul.mubr.msk.bf16.vlgmr.msra.gmra.mxu1 %vm252_vm1, %v2990_v19 }
  0x21   :  { %2560 = vmatprep.subr.bf16.mxu0 %v2982_v14  ;;  %2752 = vmatprep.mubr.msk.f32.mxu1 %vm3083_vm0, %v3082_v2 }
  0x24   :  { %2561 = vmatpush3.bf16.msra.mxu0 %v2983_v16 }
  0x25   :  { %2562 = vmatprep.subr.bf16.mxu0 %v2985_v17 }
  0x28   :  { %2563 = vmatpush3.bf16.msra.mxu0 %v2986_v18 }
  0x29   :  { %2564 = vmatprep.subr.bf16.mxu0 %v2988_v20 }
  0x2c   :  { %2565 = vmatpush3.bf16.msra.mxu0 %v2989_v22 }
  0x2d   :  { %2760 = vmatprep.subr.mxu0 %v3082_v2 }
  0x2f   :  { %289 = vmatmul.mubr.bf16.vlgmr.msra.gmra.mxu0 %v2991_v23 }
  0x30   :  { %2776 = vmatprep.mubr.msk.f32.mxu0 %vm3083_vm0, %v3082_v2 }
  0x31   :  { %27 = vsyncpa [#allocation9], 0  ;;  %s3840_s1 = sld [smem:[#allocation13_spill]]  ;;  %vm430_vm2 = vcmask 64512   ;;  %v504_v57 = vlaneseq  ;;  %vm696_vm3 = vcmask 517120   ;;  %vm735_vm4 = vcmask 519170  }
  0x32   :  { %s3841_s24 = sld [smem:[#allocation14_spill]]  ;;  %s3084_s27 = smov 64   ;;  %vm707_vm5 = vcmask 1041920   ;;  %vm747_vm6 = vcmask 1043970   ;;  %vm1124_vm7 = vcmask 130048   ;;  %vm1378_vm8 = vcmask 519168  }
  0x33   :  { %v3347_v58 = vshrl.u32 %v504_v57, 7  ;;  %s3842_s26 = sld [smem:[#allocation15_spill]]  ;;  %vm1380_vm9 = vcmask 523268   ;;  %vm1384_vm10 = vcmask 516096   ;;  %vm1438_vm11 = vcmask 517121  }
  0x34   :  { %s3843_s3 = sld [smem:[#allocation17_spill]]  ;;  %vm1400_vm12 = vcmask 1040896   ;;  %vm1455_vm13 = vcmask 1041921   ;;  %vm1857_vm14 = vcmask 261120  }
  0x35   :  { %v3350_v59 = vsub.s32 0, %v3347_v58  ;;  %s3844_s25 = sld [smem:[#allocation16_spill]] }
  0x37   :  { %v345_v24 = vld [vmem:[%s3840_s1 + $0x38] sm:$0xff]  ;;  %v344_v25 = vld [vmem:[%s3840_s1 + $0x30] sm:$0xff]  ;;  %v343_v26 = vld [vmem:[%s3840_s1 + $0x28] sm:$0xff] }
  0x38   :  { %2737 = vmatpush3.msra.mxu1 %v345_v24  ;;  %2761 = vmatpush3.msra.mxu0 %v345_v24  ;;  %v342_v27 = vld [vmem:[%s3840_s1 + $0x20] sm:$0xff]  ;;  %v341_v28 = vld [vmem:[%s3840_s1 + $0x18] sm:$0xff]  ;;  %v340_v29 = vld [vmem:[%s3840_s1 + $0x10] sm:$0xff] }
  0x39   :  { %2738 = vmatprep.subr.mxu1 %v3082_v2  ;;  %2762 = vmatprep.subr.mxu0 %v3082_v2  ;;  %v339_v30 = vld [vmem:[%s3840_s1 + $0x8] sm:$0xff]  ;;  %v338_v31 = vld [vmem:[%s3840_s1] sm:$0xff] }
  0x3a   :  { %2739 = vmatpush3.msra.mxu1 %v344_v25  ;;  %2763 = vmatpush3.msra.mxu0 %v344_v25  ;;  %v346_v53 = vld [vmem:[%s3841_s24] sm:$0xff]  ;;  %v2994_v20 = vld [vmem:[%s3843_s3 + $0x98] sm:$0xff]   ;;  %v2995_v21 = vld [vmem:[%s3843_s3 + $0x90] sm:$0xff]  }
  0x3b   :  { %2740 = vmatprep.subr.mxu1 %v3082_v2  ;;  %2764 = vmatprep.subr.mxu0 %v3082_v2  ;;  %v595_v17 = vld [vmem:[%s3842_s26] sm:$0x1]  ;;  %v2996_v22 = vld [vmem:[%s3843_s3 + $0x88] sm:$0xff]   ;;  %v2999_v24 = vld [vmem:[%s3843_s3 + $0x78] sm:$0xff]  }
  0x3c   :  { %2741 = vmatpush3.msra.mxu1 %v343_v26  ;;  %2765 = vmatpush3.msra.mxu0 %v343_v26  ;;  %v2997_v23 = vld [vmem:[%s3843_s3 + $0x80] sm:$0xff]   ;;  %v3000_v25 = vld [vmem:[%s3843_s3 + $0x38] sm:$0xff]   ;;  %v3001_v26 = vld [vmem:[%s3843_s3 + $0x70] sm:$0xff]  }
  0x3d   :  { %2742 = vmatprep.subr.mxu1 %v3082_v2  ;;  %2766 = vmatprep.subr.mxu0 %v3082_v2 }
  0x3e   :  { %2743 = vmatpush3.msra.mxu1 %v342_v27  ;;  %2767 = vmatpush3.msra.mxu0 %v342_v27  ;;  %v3002_v27 = vld [vmem:[%s3843_s3 + $0x30] sm:$0xff]  }
  0x3f   :  { %2744 = vmatprep.subr.mxu1 %v3082_v2  ;;  %2768 = vmatprep.subr.mxu0 %v3082_v2 }
  0x40   :  { %2745 = vmatpush3.msra.mxu1 %v341_v28  ;;  %2769 = vmatpush3.msra.mxu0 %v341_v28  ;;  %v3003_v28 = vld [vmem:[%s3843_s3 + $0x68] sm:$0xff]  }
  0x41   :  { %2746 = vmatprep.subr.mxu1 %v3082_v2  ;;  %2770 = vmatprep.subr.mxu0 %v3082_v2 }
  0x42   :  { %2747 = vmatpush3.msra.mxu1 %v340_v29  ;;  %2771 = vmatpush3.msra.mxu0 %v340_v29  ;;  %v3004_v29 = vld [vmem:[%s3843_s3 + $0x28] sm:$0xff]  }
  0x43   :  { %2748 = vmatprep.subr.mxu1 %v3082_v2  ;;  %2772 = vmatprep.subr.mxu0 %v3082_v2 }
  0x44   :  { %2749 = vmatpush3.msra.mxu1 %v339_v30  ;;  %2773 = vmatpush3.msra.mxu0 %v339_v30  ;;  %v3005_v30 = vld [vmem:[%s3843_s3 + $0x60] sm:$0xff]  }
  0x45   :  { %2750 = vmatprep.subr.mxu1 %v3082_v2  ;;  %2774 = vmatprep.subr.mxu0 %v3082_v2 }
  0x46   :  { %2751 = vmatpush3.msra.mxu1 %v338_v31  ;;  %2775 = vmatpush3.msra.mxu0 %v338_v31  ;;  %v3006_v31 = vld [vmem:[%s3843_s3 + $0x20] sm:$0xff]  }
  0x47   :  { %2755 = vmatprep.subr.mxu1 %v3082_v2  ;;  %2784 = vmatprep.subr.bf16.mxu0 %v3082_v2 }
  0xe0   :  { %v331_v32 = vpop.f32.mrf.mxu1 }
  0xe2   :  { %v2734_v33 = vpop.f32.mrf.mxu1 }
  0xe4   :  { %v334_v34 = vpop.f32.mrf.mxu1 }
  0xe6   :  { %v2735_v35 = vpop.f32.mrf.mxu1 }
  0xef   :  { %v2566_v36 = vpop.f32.mrf.mxu0 }
  0xf1   :  { %v2567_v37 = vpop.f32.mrf.mxu0 }
  0xf2   :  { %v2568_v38 = vadd.f32 %v2567_v37, %v2566_v36 }
  0xf3   :  { %v2569_v39 = vpop.f32.mrf.mxu0 }
  0xf4   :  { %v332_v41 = vadd.f32 %v2568_v38, %v331_v32 }
  0xf5   :  { %v2570_v40 = vpop.f32.mrf.mxu0 }
  0xf6   :  { %v2571_v42 = vadd.f32 %v2570_v40, %v2569_v39  ;;  %v347_v44 = vsel %vm252_vm1, %v332_v41, 0.0 }
  0xf8   :  { %v335_v43 = vadd.f32 %v2571_v42, %v334_v34  ;;  %v2459_v34 = vld [vmem:[%s3844_s25] ss:$0 sm:$0xff]  ;;  %v3007_v42 = vld [vmem:[%s3843_s3 + $0x58] sm:$0xff]  }
  0xfa   :  { %v348_v45 = vsel %vm252_vm1, %v335_v43, 0.0 }
  0xfb   :  { %v349_v46 = vadd.f32 %v348_v45, %v347_v44  ;;  %v3009_v44 = vld [vmem:[%s3843_s3 + $0x50] sm:$0xff]  }
  0xfc   :  { %v3010_v45 = vld [vmem:[%s3843_s3 + $0x10] sm:$0xff]  }
  0xfd   :  { %v350_v47 = vrot.slane %v349_v46, 4 }
  0xff   :  { %v351_v48 = vadd.f32 %v350_v47, %v349_v46  ;;  %v3011_v46 = vld [vmem:[%s3843_s3 + $0x48] sm:$0xff]  }
 0x100   :  { %v3012_v47 = vld [vmem:[%s3843_s3 + $0x8] sm:$0xff]  }
 0x101   :  { %v352_v49 = vrot.slane %v351_v48, 2 }
 0x103   :  { %v353_v50 = vadd.f32 %v352_v49, %v351_v48  ;;  %v3013_v48 = vld [vmem:[%s3843_s3 + $0x40] sm:$0xff]  }
 0x105   :  { %v354_v51 = vrot.slane %v353_v50, 1 }
 0x107   :  { %v355_v52 = vadd.f32 %v354_v51, %v353_v50 }
 0x109   :  { %2753 = vmatmul.mubr.msk.f32.vlgmr.msra.gmra.mxu1 %vm252_vm1, %v355_v52 }
 0x10a   :  { %2756 = vmatpush3.msra.mxu1 %v346_v53  ;;  %2757 = vmatprep.mubr.msk.f32.mxu1 %vm3083_vm0, %v3082_v2 }
 0x10b   :  { %2779 = vmatprep.subr.mxu1 %v3082_v2 }
 0x1c9   :  { %v425_v54 = vpop.f32.mrf.mxu1 }
 0x1ca   :  { %v429_v55 = vmul.f32 0.0078125, %v425_v54 }
 0x1cb   :  { %v2754_v56 = vpop.f32.mrf.mxu1 }
 0x1cc   :  { %2758 = vmatmul.mubr.msk.f32.vlgmr.msra.gmra.mxu1 %vm430_vm2, %v429_v55 }
 0x1cd   :  { %2780 = vmatpush3.msra.mxu1 %v346_v53  ;;  %2781 = vmatprep.mubr.msk.f32.mxu1 %vm3083_vm0, %v3082_v2 }
 0x1ce   :  { %2599 = vmatprep.subr.bf16.mxu1 %v2999_v24 }
 0x28c   :  { %v500_v60 = vpop.f32.mrf.mxu1 }
 0x28d   :  { %v507_v61 = vrot.slane %v500_v60, %v3350_v59  ;;  %v3014_v60 = vld [vmem:[%s3843_s3] sm:$0xff]  }
 0x28e   :  { %v2759_v62 = vpop.f32.mrf.mxu1 }
 0x28f   :  { %v508_v63 = vsub.f32 %v332_v41, %v507_v61  ;;  %v509_v0 = vsub.f32 %v335_v43, %v507_v61  ;;  %v3008_v43 = vld [vmem:[%s3843_s3 + $0x18] sm:$0xff]  }
 0x291   :  { %v510_v1 = vmul.f32 %v508_v63, %v508_v63  ;;  %v511_v3 = vmul.f32 %v509_v0, %v509_v0 }
 0x293   :  { %v512_v4 = vsel %vm252_vm1, %v510_v1, 0.0  ;;  %v513_v5 = vsel %vm252_vm1, %v511_v3, 0.0 }
 0x294   :  { %v514_v6 = vadd.f32 %v513_v5, %v512_v4 }
 0x296   :  { %v515_v7 = vrot.slane %v514_v6, 4 }
 0x298   :  { %v516_v8 = vadd.f32 %v515_v7, %v514_v6 }
 0x29a   :  { %v517_v9 = vrot.slane %v516_v8, 2 }
 0x29c   :  { %v518_v10 = vadd.f32 %v517_v9, %v516_v8 }
 0x29e   :  { %v519_v11 = vrot.slane %v518_v10, 1 }
 0x2a0   :  { %v520_v12 = vadd.f32 %v519_v11, %v518_v10 }
 0x2a2   :  { %2777 = vmatmul.mubr.msk.f32.vlgmr.msra.gmra.mxu0 %vm252_vm1, %v520_v12 }
 0x2a3   :  { %2792 = vmatprep.mubr.msk.bf16.mxu0 %vm3083_vm0, %v3082_v2  ;;  %2785 = vmatpush3.bf16.msra.mxu0 %v2994_v20 }
 0x2a4   :  { %2786 = vmatprep.subr.bf16.mxu0 %v3082_v2 }
 0x2a7   :  { %2787 = vmatpush3.bf16.msra.mxu0 %v2995_v21  ;;  %v1040_v21 = vld [vmem:[%s3811_s7 + $0x38] sm:$0xff] }
 0x2a8   :  { %2788 = vmatprep.subr.bf16.mxu0 %v3082_v2 }
 0x2ab   :  { %2789 = vmatpush3.bf16.msra.mxu0 %v2996_v22 }
 0x2ac   :  { %2790 = vmatprep.subr.bf16.mxu0 %v3082_v2 }
 0x2af   :  { %2791 = vmatpush3.bf16.msra.mxu0 %v2997_v23  ;;  %v1039_v23 = vld [vmem:[%s3811_s7 + $0x30] sm:$0xff] }
 0x2b0   :  { %2796 = vmatprep.subr.mxu0 %v3082_v2 }
 0x362   :  { %v590_v13 = vpop.f32.mrf.mxu0 }
 0x363   :  { %v594_v14 = vmul.f32 0.0078125, %v590_v13 }
 0x364   :  { %v2778_v15 = vpop.f32.mrf.mxu0 }
 0x365   :  { %v596_v16 = vadd.f32 1e-05, %v594_v14 }
 0x367   :  { %3054 = vrsqrt.f32 %v596_v16 }
 0x374   :  { %v3055_v18 = vpop.eup %3054 }
 0x375   :  { %v598_v19 = vmul.f32 %v3055_v18, %v595_v17 }
 0x377   :  { %2782 = vmatmul.mubr.msk.f32.vlgmr.msra.gmra.mxu1 %vm430_vm2, %v598_v19 }
 0x378   :  { %2600 = vmatpush3.bf16.msra.mxu1 %v3000_v25  ;;  %v1038_v25 = vld [vmem:[%s3811_s7 + $0x28] sm:$0xff] }
 0x379   :  { %2601 = vmatprep.subr.bf16.mxu1 %v3001_v26  ;;  %v1037_v26 = vld [vmem:[%s3811_s7 + $0x20] sm:$0xff] }
 0x37c   :  { %2602 = vmatpush3.bf16.msra.mxu1 %v3002_v27  ;;  %v1036_v27 = vld [vmem:[%s3811_s7 + $0x18] sm:$0xff] }
 0x37d   :  { %2603 = vmatprep.subr.bf16.mxu1 %v3003_v28  ;;  %v1035_v28 = vld [vmem:[%s3811_s7 + $0x10] sm:$0xff] }
 0x380   :  { %2604 = vmatpush3.bf16.msra.mxu1 %v3004_v29  ;;  %v1034_v29 = vld [vmem:[%s3811_s7 + $0x8] sm:$0xff] }
 0x381   :  { %2605 = vmatprep.subr.bf16.mxu1 %v3005_v30  ;;  %v1042_v30 = vld [vmem:[%s3812_s8 + $0x8] sm:$0xff] }
 0x384   :  { %2606 = vmatpush3.bf16.msra.mxu1 %v3006_v31  ;;  %v1041_v31 = vld [vmem:[%s3812_s8] sm:$0xff] }
 0x385   :  { %2607 = vmatprep.subr.bf16.mxu1 %v3007_v42 }
 0x388   :  { %2608 = vmatpush3.bf16.msra.mxu1 %v3008_v43 }
 0x389   :  { %2609 = vmatprep.subr.bf16.mxu1 %v3009_v44 }
 0x38c   :  { %2610 = vmatpush3.bf16.msra.mxu1 %v3010_v45 }
 0x38d   :  { %2611 = vmatprep.subr.bf16.mxu1 %v3011_v46 }
 0x390   :  { %2612 = vmatpush3.bf16.msra.mxu1 %v3012_v47 }
 0x391   :  { %2613 = vmatprep.subr.bf16.mxu1 %v3013_v48 }
 0x394   :  { %2614 = vmatpush3.bf16.msra.mxu1 %v3014_v60 }
 0x395   :  { %2815 = vmatprep.subr.mxu1 %v3082_v2 }
 0x437   :  { %v668_v32 = vpop.f32.mrf.mxu1 }
 0x438   :  { %v675_v33 = vrot.slane %v668_v32, %v3350_v59  ;;  %v1033_v32 = vld [vmem:[%s3811_s7] sm:$0xff] }
 0x439   :  { %v2783_v35 = vpop.f32.mrf.mxu1 }
 0x43a   :  { %v676_v36 = vmul.f32 %v675_v33, %v508_v63  ;;  %v677_v37 = vmul.f32 %v675_v33, %v509_v0 }
 0x43c   :  { %v685_v38 = vadd.f32 %v2459_v34, %v676_v36  ;;  %v686_v39 = vadd.f32 %v2459_v34, %v677_v37 }
 0x43e   :  { %v687_v40 = vmax.f32 %v685_v38, 0.0  ;;  %v688_v41 = vmax.f32 %v686_v39, 0.0 }
 0x440   :  { %692 = vst.msk [vmem:[#allocation2 + $0x2] sm:$0xff] %vm252_vm1, %v687_v40  ;;  %693 = vst.msk [vmem:[#allocation2 + $0xe] sm:$0xff] %vm252_vm1, %v688_v41 }
 0x447   :  { %v724_v49 = vld [vmem:[#allocation2 + $0x4] ss:$2 sm:$0xf]  ;;  %v699_v51 = vld [vmem:[#allocation2 + $0x1] ss:$2 sm:$0xf] }
 0x448   :  { %v725_v50 = vpack.c.bf16 %v724_v49, %v724_v49  ;;  %v738_v52 = vld [vmem:[#allocation2 + $0xd] ss:$2 sm:$0xf]  ;;  %v2543_v53 = vpack.c.bf16 %v699_v51, %v699_v51  ;;  %v714_v55 = vld [vmem:[#allocation2 + $0x3] ss:$2 sm:$0xf] }
 0x449   :  { %v2546_v54 = vpack.c.bf16 %v738_v52, %v738_v52  ;;  %v759_v56 = vld [vmem:[#allocation2 + $0xf] ss:$2 sm:$0xf]  ;;  %v694_v57 = vld [vmem:[#allocation2] ss:$2 sm:$0xf]  ;;  %v2544_v4 = vpack.c.bf16 %v714_v55, %v714_v55 }
 0x44a   :  { %726 = vst.msk [vmem:[#allocation3 + $0x8] sm:$0x3] %vm696_vm3, %v725_v50  ;;  %704 = vrot.lane.b32.xlu0 %v2543_v53, %s3084_s27  ;;  %v2548_v62 = vpack.c.bf16 %v759_v56, %v759_v56  ;;  %v695_v63 = vpack.c.bf16 %v694_v57, %v694_v57  ;;  %v728_v0 = vld [vmem:[#allocation2 + $0xc] ss:$2 sm:$0xf] }
 0x44b   :  { %v743_v61 = vrot.slane %v2546_v54, 6  ;;  %v2545_v1 = vpack.c.bf16 %v728_v0, %v728_v0  ;;  %v710_v3 = vld [vmem:[#allocation2 + $0x2] ss:$2 sm:$0xf] }
 0x44c   :  { %697 = vst.msk [vmem:[#allocation3] sm:$0x3] %vm696_vm3, %v695_v63  ;;  %v711_v5 = vpack.c.bf16 %v710_v3, %v710_v3  ;;  %v750_v6 = vld [vmem:[#allocation2 + $0xe] ss:$2 sm:$0xf]  ;;  %v764_v9 = vrot.slane %v2548_v62, 6 }
 0x44d   :  { %744 = vrot.lane.b32.xlu1 %v743_v61, %s3084_s27  ;;  %v733_v7 = vrot.slane %v2545_v1, 6  ;;  %v2547_v8 = vpack.c.bf16 %v750_v6, %v750_v6 }
 0x44e   :  { %719 = vrot.lane.b32.xlu0 %v2544_v4, %s3084_s27  ;;  %712 = vst.msk [vmem:[#allocation3 + $0x4] sm:$0x3] %vm696_vm3, %v711_v5  ;;  %v1285_v4 = vld [vmem:[%s3813_s9] sm:$0x1] }
 0x44f   :  { %736 = vst.msk [vmem:[#allocation3] sm:$0xc] %vm735_vm4, %v733_v7  ;;  %v755_v10 = vrot.slane %v2547_v8, 6  ;;  %v3017_v7 = vld [vmem:[%s3815_s11 + $0x78] sm:$0xff]  }
 0x450   :  { %v3018_v8 = vld [vmem:[%s3815_s11 + $0x38] sm:$0xff]  }
 0x451   :  { %765 = vrot.lane.b32.xlu1 %v764_v9, %s3084_s27  ;;  %757 = vst.msk [vmem:[#allocation3 + $0x4] sm:$0xc] %vm735_vm4, %v755_v10  ;;  %v2998_v11 = vld [vmem:[#allocation3 + $0x8] ss:$0 sps:$4 sm:$0xff]   ;;  %v3019_v9 = vld [vmem:[%s3815_s11 + $0x70] sm:$0xff]  }
 0x452   :  { %2793 = vmatmul.mubr.msk.bf16.vlgmr.msra.gmra.mxu0 %vm252_vm1, %v2998_v11  ;;  %v3020_v10 = vld [vmem:[%s3815_s11 + $0x30] sm:$0xff]   ;;  %v3021_v11 = vld [vmem:[%s3815_s11 + $0x68] sm:$0xff]  }
 0x453   :  { %2812 = vmatprep.mubr.msk.f32.mxu0 %vm3083_vm0, %v3082_v2  ;;  %2797 = vmatpush3.msra.mxu0 %v1040_v21 }
 0x454   :  { %2798 = vmatprep.subr.mxu0 %v3082_v2 }
 0x455   :  { %2799 = vmatpush3.msra.mxu0 %v1039_v23 }
 0x456   :  { %2800 = vmatprep.subr.mxu0 %v3082_v2 }
 0x457   :  { %2801 = vmatpush3.msra.mxu0 %v1038_v25 }
 0x458   :  { %2802 = vmatprep.subr.mxu0 %v3082_v2 }
 0x459   :  { %2803 = vmatpush3.msra.mxu0 %v1037_v26 }
 0x45a   :  { %2804 = vmatprep.subr.mxu0 %v3082_v2 }
 0x45b   :  { %2805 = vmatpush3.msra.mxu0 %v1036_v27 }
 0x45c   :  { %2806 = vmatprep.subr.mxu0 %v3082_v2 }
 0x45d   :  { %2807 = vmatpush3.msra.mxu0 %v1035_v28 }
 0x45e   :  { %2808 = vmatprep.subr.mxu0 %v3082_v2 }
 0x45f   :  { %2809 = vmatpush3.msra.mxu0 %v1034_v29 }
 0x460   :  { %2810 = vmatprep.subr.mxu0 %v3082_v2 }
 0x461   :  { %2811 = vmatpush3.msra.mxu0 %v1033_v32 }
 0x462   :  { %2822 = vmatprep.subr.mxu0 %v3082_v2 }
 0x4bc   :  { %v705_v12 = vpop.permute.xlu0 %704 }
 0x4bd   :  { %708 = vst.msk [vmem:[#allocation3] sm:$0x3] %vm707_vm5, %v705_v12  ;;  %v3022_v12 = vld [vmem:[%s3815_s11 + $0x28] sm:$0xff]  }
 0x4bf   :  { %v745_v13 = vpop.permute.xlu1 %744 }
 0x4c0   :  { %748 = vst.msk [vmem:[#allocation3] sm:$0xc] %vm747_vm6, %v745_v13  ;;  %v720_v14 = vpop.permute.xlu0 %719  ;;  %v3023_v13 = vld [vmem:[%s3815_s11 + $0x60] sm:$0xff]  }
 0x4c1   :  { %722 = vst.msk [vmem:[#allocation3 + $0x4] sm:$0x3] %vm707_vm5, %v720_v14  ;;  %v3024_v14 = vld [vmem:[%s3815_s11 + $0x20] sm:$0xff]  }
 0x4c3   :  { %v766_v15 = vpop.permute.xlu1 %765 }
 0x4c4   :  { %768 = vst.msk [vmem:[#allocation3 + $0x4] sm:$0xc] %vm747_vm6, %v766_v15 }
 0x4cb   :  { %v778_v16 = vld [vmem:[#allocation3] sm:$0xff] }
 0x4cc   :  { %v2467_v17 = vcombine.low %v778_v16, %v778_v16  ;;  %v2468_v18 = vcombine.high %v778_v16, %v778_v16 }
 0x4ce   :  { %985 = vmatprep.mubr.bf16.mxu1 %v2468_v18 }
 0x4cf   :  { %986 = vmatmul.mubr.bf16.vlgmr.msra.gmra.mxu1 %v2467_v17  ;;  %v2495_v17 = vld [vmem:[%s3814_s10] ss:$0 sm:$0xff] }
 0x4d0   :  { %2819 = vmatprep.mubr.msk.f32.mxu1 %vm3083_vm0, %v3082_v2  ;;  %2816 = vmatpush3.msra.mxu1 %v1042_v30 }
 0x4d1   :  { %2817 = vmatprep.subr.mxu1 %v3082_v2 }
 0x4d2   :  { %2818 = vmatpush3.msra.mxu1 %v1041_v31 }
 0x4d3   :  { %2841 = vmatprep.subr.mxu1 %v3082_v2 }
 0x512   :  { %v1027_v19 = vpop.f32.mrf.mxu0 }
 0x514   :  { %v2794_v20 = vpop.f32.mrf.mxu0 }
 0x516   :  { %v1030_v22 = vpop.f32.mrf.mxu0 }
 0x518   :  { %v2795_v24 = vpop.f32.mrf.mxu0 }
 0x519   :  { %v3025_v24 = vld [vmem:[%s3815_s11 + $0x58] sm:$0xff]  }
 0x58f   :  { %v2615_v33 = vpop.f32.mrf.mxu1 }
 0x591   :  { %v2616_v34 = vpop.f32.mrf.mxu1 }
 0x592   :  { %v2617_v35 = vadd.f32 %v2616_v34, %v2615_v33  ;;  %v3033_v34 = vld [vmem:[%s3815_s11 + $0x8] sm:$0xff]  }
 0x593   :  { %v2618_v36 = vpop.f32.mrf.mxu1 }
 0x594   :  { %v1028_v37 = vadd.f32 %v2617_v35, %v1027_v19 }
 0x595   :  { %v2619_v38 = vpop.f32.mrf.mxu1 }
 0x596   :  { %v1043_v39 = vsel %vm252_vm1, %v1028_v37, 0.0  ;;  %v3035_v38 = vld [vmem:[%s3815_s11 + $0x80] sm:$0xff]  }
 0x597   :  { %v1044_v40 = vrot.slane %v1043_v39, 4 }
 0x599   :  { %v1045_v41 = vadd.f32 %v1044_v40, %v1043_v39 }
 0x59b   :  { %v1046_v42 = vrot.slane %v1045_v41, 2 }
 0x59d   :  { %v1047_v43 = vadd.f32 %v1046_v42, %v1045_v41 }
 0x59f   :  { %v1048_v44 = vrot.slane %v1047_v43, 1 }
 0x5a1   :  { %v1049_v45 = vadd.f32 %v1048_v44, %v1047_v43  ;;  %v3036_v43 = vld [vmem:[%s3815_s11] sm:$0xff]  }
 0x5a3   :  { %2813 = vmatmul.mubr.msk.f32.vlgmr.msra.gmra.mxu0 %vm252_vm1, %v1049_v45 }
 0x5a4   :  { %2823 = vmatpush3.msra.mxu0 %v1040_v21  ;;  %2838 = vmatprep.mubr.msk.f32.mxu0 %vm3083_vm0, %v3082_v2  ;;  %v3085_v21 = vmov 1983009808  }
 0x5a5   :  { %2824 = vmatprep.subr.mxu0 %v3082_v2  ;;  %v1391_v22 = vunpack.c.l.s4 %v3085_v21  ;;  %v3635_v21 = vld [vmem:[%s3816_s12 + $0x20] sm:$0xff] }
 0x5a6   :  { %2825 = vmatpush3.msra.mxu0 %v1039_v23 }
 0x5a7   :  { %2826 = vmatprep.subr.mxu0 %v3082_v2 }
 0x5a8   :  { %2827 = vmatpush3.msra.mxu0 %v1038_v25  ;;  %v3026_v25 = vld [vmem:[%s3815_s11 + $0x98] sm:$0xff]  }
 0x5a9   :  { %2828 = vmatprep.subr.mxu0 %v3082_v2 }
 0x5aa   :  { %2829 = vmatpush3.msra.mxu0 %v1037_v26  ;;  %v3027_v26 = vld [vmem:[%s3815_s11 + $0x18] sm:$0xff]  }
 0x5ab   :  { %2830 = vmatprep.subr.mxu0 %v3082_v2 }
 0x5ac   :  { %2831 = vmatpush3.msra.mxu0 %v1036_v27  ;;  %v1392_v27 = vunpack.c.0.s8 %v1391_v22  ;;  %v3642_v22 = vld [vmem:[%s3816_s12 + $0x18] sm:$0xff] }
 0x5ad   :  { %2832 = vmatprep.subr.mxu0 %v3082_v2 }
 0x5ae   :  { %2833 = vmatpush3.msra.mxu0 %v1035_v28  ;;  %v3028_v28 = vld [vmem:[%s3815_s11 + $0x50] sm:$0xff]   ;;  %v3567_v33 = vsub.s32 %v1392_v27, %v3347_v58  ;;  %v1764_v27 = vld [vmem:[%s3816_s12] sm:$0xff] }
 0x5af   :  { %2834 = vmatprep.subr.mxu0 %v3082_v2 }
 0x5b0   :  { %2835 = vmatpush3.msra.mxu0 %v1034_v29  ;;  %v3029_v29 = vld [vmem:[%s3815_s11 + $0x90] sm:$0xff]  }
 0x5b1   :  { %2836 = vmatprep.subr.mxu0 %v3082_v2 }
 0x5b2   :  { %2837 = vmatpush3.msra.mxu0 %v1033_v32  ;;  %v3032_v32 = vld [vmem:[%s3815_s11 + $0x88] sm:$0xff]  }
 0x5b3   :  { %2848 = vmatprep.subr.bf16.mxu0 %v3082_v2 }
 0x663   :  { %v1119_v46 = vpop.f32.mrf.mxu0 }
 0x664   :  { %v1123_v47 = vmul.f32 0.03125, %v1119_v46 }
 0x665   :  { %v2814_v48 = vpop.f32.mrf.mxu0 }
 0x666   :  { %2820 = vmatmul.mubr.msk.f32.vlgmr.msra.gmra.mxu1 %vm1124_vm7, %v1123_v47 }
 0x667   :  { %2842 = vmatpush3.msra.mxu1 %v1042_v30  ;;  %2845 = vmatprep.mubr.msk.f32.mxu1 %vm3083_vm0, %v3082_v2  ;;  %v3030_v30 = vld [vmem:[%s3815_s11 + $0x10] sm:$0xff]  }
 0x668   :  { %2843 = vmatprep.subr.mxu1 %v3082_v2 }
 0x669   :  { %2844 = vmatpush3.msra.mxu1 %v1041_v31  ;;  %v3031_v31 = vld [vmem:[%s3815_s11 + $0x48] sm:$0xff]  }
 0x66a   :  { %2650 = vmatprep.subr.bf16.mxu1 %v3017_v7 }
 0x726   :  { %v1194_v49 = vpop.f32.mrf.mxu1 }
 0x727   :  { %v1201_v50 = vrot.slane %v1194_v49, %v3350_v59 }
 0x728   :  { %v2821_v51 = vpop.f32.mrf.mxu1 }
 0x729   :  { %v1202_v52 = vsub.f32 %v1028_v37, %v1201_v50  ;;  %v3034_v37 = vld [vmem:[%s3815_s11 + $0x40] sm:$0xff]  }
 0x72b   :  { %v1203_v53 = vmul.f32 %v1202_v52, %v1202_v52 }
 0x72d   :  { %v1204_v54 = vsel %vm252_vm1, %v1203_v53, 0.0 }
 0x72e   :  { %v1205_v55 = vrot.slane %v1204_v54, 4 }
 0x730   :  { %v1206_v56 = vadd.f32 %v1205_v55, %v1204_v54 }
 0x732   :  { %v1207_v57 = vrot.slane %v1206_v56, 2 }
 0x734   :  { %v1208_v60 = vadd.f32 %v1207_v57, %v1206_v56 }
 0x736   :  { %v1209_v61 = vrot.slane %v1208_v60, 1 }
 0x738   :  { %v1210_v62 = vadd.f32 %v1209_v61, %v1208_v60 }
 0x73a   :  { %2839 = vmatmul.mubr.msk.f32.vlgmr.msra.gmra.mxu0 %vm252_vm1, %v1210_v62 }
 0x73b   :  { %2856 = vmatprep.mubr.msk.bf16.mxu0 %vm3083_vm0, %v3082_v2  ;;  %2849 = vmatpush3.bf16.msra.mxu0 %v3026_v25  ;;  %v1775_v25 = vld [vmem:[%s3817_s13 + $0x18] sm:$0xff] }
 0x73c   :  { %2850 = vmatprep.subr.bf16.mxu0 %v3082_v2 }
 0x73f   :  { %2851 = vmatpush3.bf16.msra.mxu0 %v3029_v29 }
 0x740   :  { %2852 = vmatprep.subr.bf16.mxu0 %v3082_v2 }
 0x743   :  { %2853 = vmatpush3.bf16.msra.mxu0 %v3032_v32 }
 0x744   :  { %2854 = vmatprep.subr.bf16.mxu0 %v3082_v2 }
 0x747   :  { %2855 = vmatpush3.bf16.msra.mxu0 %v3035_v38 }
 0x748   :  { %2860 = vmatprep.subr.mxu0 %v3082_v2 }
 0x7fa   :  { %v1280_v63 = vpop.f32.mrf.mxu0 }
 0x7fb   :  { %v1284_v0 = vmul.f32 0.03125, %v1280_v63 }
 0x7fc   :  { %v2840_v1 = vpop.f32.mrf.mxu0 }
 0x7fd   :  { %v1286_v3 = vadd.f32 1e-05, %v1284_v0 }
 0x7ff   :  { %3056 = vrsqrt.f32 %v1286_v3 }
 0x80c   :  { %v3057_v5 = vpop.eup %3056 }
 0x80d   :  { %v1288_v6 = vmul.f32 %v3057_v5, %v1285_v4 }
 0x80f   :  { %2846 = vmatmul.mubr.msk.f32.vlgmr.msra.gmra.mxu1 %vm1124_vm7, %v1288_v6 }
 0x810   :  { %2651 = vmatpush3.bf16.msra.mxu1 %v3018_v8 }
 0x811   :  { %2652 = vmatprep.subr.bf16.mxu1 %v3019_v9 }
 0x814   :  { %2653 = vmatpush3.bf16.msra.mxu1 %v3020_v10 }
 0x815   :  { %2654 = vmatprep.subr.bf16.mxu1 %v3021_v11 }
 0x818   :  { %2655 = vmatpush3.bf16.msra.mxu1 %v3022_v12 }
 0x819   :  { %2656 = vmatprep.subr.bf16.mxu1 %v3023_v13 }
 0x81c   :  { %2657 = vmatpush3.bf16.msra.mxu1 %v3024_v14 }
 0x81d   :  { %2658 = vmatprep.subr.bf16.mxu1 %v3025_v24  ;;  %v3654_v24 = vld [vmem:[%s3816_s12 + $0x8] sm:$0xff] }
 0x820   :  { %2659 = vmatpush3.bf16.msra.mxu1 %v3027_v26  ;;  %v1774_v26 = vld [vmem:[%s3817_s13 + $0x10] sm:$0xff] }
 0x821   :  { %2660 = vmatprep.subr.bf16.mxu1 %v3028_v28  ;;  %v1773_v28 = vld [vmem:[%s3817_s13 + $0x8] sm:$0xff] }
 0x824   :  { %2661 = vmatpush3.bf16.msra.mxu1 %v3030_v30 }
 0x825   :  { %2662 = vmatprep.subr.bf16.mxu1 %v3031_v31 }
 0x828   :  { %2663 = vmatpush3.bf16.msra.mxu1 %v3033_v34 }
 0x829   :  { %2664 = vmatprep.subr.bf16.mxu1 %v3034_v37 }
 0x82c   :  { %2665 = vmatpush3.bf16.msra.mxu1 %v3036_v43 }
 0x82d   :  { %2879 = vmatprep.subr.mxu1 %v3082_v2 }
 0x8cf   :  { %v1358_v15 = vpop.f32.mrf.mxu1 }
 0x8d0   :  { %v1365_v16 = vrot.slane %v1358_v15, %v3350_v59 }
 0x8d1   :  { %v2847_v18 = vpop.f32.mrf.mxu1 }
 0x8d2   :  { %v1366_v19 = vmul.f32 %v1365_v16, %v1202_v52  ;;  %v3614_v18 = vld [vmem:[%s3816_s12 + $0x38] sm:$0xff] }
 0x8d4   :  { %v1374_v20 = vadd.f32 %v2495_v17, %v1366_v19  ;;  %v3621_v19 = vld [vmem:[%s3816_s12 + $0x30] sm:$0xff] }
 0x8d6   :  { %v1375_v23 = vmax.f32 %v1374_v20, 0.0  ;;  %v3628_v20 = vld [vmem:[%s3816_s12 + $0x28] sm:$0xff] }
 0x8d8   :  { %1379 = vst.msk [vmem:[#allocation4 + $0x2] sm:$0xf] %vm1378_vm8, %v1375_v23 }
 0x8d9   :  { %1381 = vst.msk [vmem:[#allocation4 + $0x6] sm:$0xf0] %vm1380_vm9, %v1375_v23  ;;  %v3648_v23 = vld [vmem:[%s3816_s12 + $0x10] sm:$0xff] }
 0x8df   :  { %v1407_v35 = vld [vmem:[#allocation4 + $0x3] ss:$2 sm:$0x3]  ;;  %v1422_v46 = vld [vmem:[#allocation4 + $0x4] ss:$2 sm:$0x3] }
 0x8e0   :  { %v1387_v36 = vld [vmem:[#allocation4 + $0x1] ss:$2 sm:$0x3]  ;;  %v1408_v39 = vpack.c.bf16 %v1407_v35, %v1407_v35  ;;  %v1472_v41 = vld [vmem:[#allocation4 + $0xb] ss:$2 sm:$0x3]  ;;  %v1423_v50 = vpack.c.bf16 %v1422_v46, %v1422_v46 }
 0x8e1   :  { %v1388_v40 = vpack.c.bf16 %v1387_v36, %v1387_v36  ;;  %v1441_v42 = vld [vmem:[#allocation4 + $0x9] ss:$2 sm:$0x3]  ;;  %v1473_v44 = vpack.c.bf16 %v1472_v41, %v1472_v41  ;;  %v1403_v47 = vld [vmem:[#allocation4 + $0x2] ss:$2 sm:$0x3] }
 0x8e2   :  { %v1442_v45 = vpack.c.bf16 %v1441_v42, %v1441_v42  ;;  %v1416_v48 = vrot.slane %v1408_v39, %v3567_v33  ;;  %v1404_v51 = vpack.c.bf16 %v1403_v47, %v1403_v47  ;;  %v1382_v52 = vld [vmem:[#allocation4] ss:$2 sm:$0x3]  ;;  %v1458_v53 = vld [vmem:[#allocation4 + $0xa] ss:$2 sm:$0x3] }
 0x8e3   :  { %v1396_v49 = vrot.slane %v1388_v40, %v3567_v33  ;;  %v1481_v54 = vrot.slane %v1473_v44, %v3567_v33  ;;  %v1383_v56 = vpack.c.bf16 %v1382_v52, %v1382_v52  ;;  %v1459_v57 = vpack.c.bf16 %v1458_v53, %v1458_v53  ;;  %v1488_v60 = vld [vmem:[#allocation4 + $0xc] ss:$2 sm:$0x3]  ;;  %v1426_v61 = vld [vmem:[#allocation4 + $0x8] ss:$2 sm:$0x3] }
 0x8e4   :  { %v1450_v55 = vrot.slane %v1442_v45, %v3567_v33  ;;  %1417 = vrot.lane.b32.xlu1 %v1416_v48, %s3084_s27  ;;  %1424 = vst.msk [vmem:[#allocation5 + $0x4] sm:$0x1] %vm1384_vm10, %v1423_v50  ;;  %1405 = vst.msk [vmem:[#allocation5 + $0x2] sm:$0x1] %vm1384_vm10, %v1404_v51  ;;  %v1489_v62 = vpack.c.bf16 %v1488_v60, %v1488_v60  ;;  %v1427_v63 = vpack.c.bf16 %v1426_v61, %v1426_v61  ;;  %v1772_v46 = vld [vmem:[%s3817_s13] sm:$0xff] }
 0x8e5   :  { %1397 = vrot.lane.b32.xlu0 %v1396_v49, %s3084_s27  ;;  %1385 = vst.msk [vmem:[#allocation5] sm:$0x1] %vm1384_vm10, %v1383_v56  ;;  %v1467_v0 = vrot.slane %v1459_v57, %v3567_v33  ;;  %v1482_v1 = vrot.slane %v1481_v54, 7 }
 0x8e6   :  { %v1451_v3 = vrot.slane %v1450_v55, 7  ;;  %v1497_v4 = vrot.slane %v1489_v62, %v3567_v33  ;;  %v1435_v5 = vrot.slane %v1427_v63, %v3567_v33 }
 0x8e7   :  { %v1468_v6 = vrot.slane %v1467_v0, 7 }
 0x8e8   :  { %1483 = vrot.lane.b32.xlu1 %v1482_v1, %s3084_s27  ;;  %v1498_v7 = vrot.slane %v1497_v4, 7  ;;  %v1436_v8 = vrot.slane %v1435_v5, 7  ;;  %v2018_v5 = vld [vmem:[%s3818_s14] sm:$0x1] }
 0x8e9   :  { %1452 = vrot.lane.b32.xlu0 %v1451_v3, %s3084_s27  ;;  %1470 = vst.msk [vmem:[#allocation5 + $0x2] sm:$0x2] %vm1438_vm11, %v1468_v6 }
 0x8ea   :  { %1500 = vst.msk [vmem:[#allocation5 + $0x4] sm:$0x2] %vm1438_vm11, %v1498_v7  ;;  %1439 = vst.msk [vmem:[#allocation5] sm:$0x2] %vm1438_vm11, %v1436_v8  ;;  %v3038_v8 = vld [vmem:[%s3820_s16 + $0x38] sm:$0xff]  }
 0x956   :  { %v1418_v9 = vpop.permute.xlu1 %1417 }
 0x957   :  { %v1398_v10 = vpop.permute.xlu0 %1397  ;;  %1420 = vst.msk [vmem:[#allocation5 + $0x2] sm:$0x1] %vm1400_vm12, %v1418_v9  ;;  %v3039_v9 = vld [vmem:[%s3820_s16 + $0x30] sm:$0xff]  }
 0x958   :  { %1401 = vst.msk [vmem:[#allocation5] sm:$0x1] %vm1400_vm12, %v1398_v10  ;;  %v3040_v10 = vld [vmem:[%s3820_s16 + $0x28] sm:$0xff]  }
 0x95a   :  { %v1484_v11 = vpop.permute.xlu1 %1483 }
 0x95b   :  { %v1453_v12 = vpop.permute.xlu0 %1452  ;;  %1486 = vst.msk [vmem:[#allocation5 + $0x2] sm:$0x2] %vm1455_vm13, %v1484_v11  ;;  %v3041_v11 = vld [vmem:[%s3820_s16 + $0x20] sm:$0xff]  }
 0x95c   :  { %1456 = vst.msk [vmem:[#allocation5] sm:$0x2] %vm1455_vm13, %v1453_v12  ;;  %v3042_v12 = vld [vmem:[%s3820_s16 + $0x18] sm:$0xff]  }
 0x963   :  { %v1501_v13 = vld [vmem:[#allocation5] sm:$0x3f] }
 0x964   :  { %v1543_v14 = vcombine.high %v1501_v13, %v1501_v13  ;;  %v1550_v15 = vrot.slane %v1501_v13, %v3567_v33  ;;  %v3043_v13 = vld [vmem:[%s3820_s16 + $0x10] sm:$0xff]  }
 0x966   :  { %v1557_v16 = vrot.slane %v1543_v14, %v3567_v33  ;;  %v1558_v17 = vcombine.high %v1550_v15, %v1550_v15 }
 0x968   :  { %1716 = vmatprep.mubr.bf16.mxu1 %v1558_v17  ;;  %2857 = vmatmul.mubr.msk.bf16.vlgmr.msra.gmra.mxu0 %vm252_vm1, %v1557_v16  ;;  %v2521_v16 = vld [vmem:[%s3819_s15] ss:$0 sm:$0xff] }
 0x969   :  { %1717 = vmatmul.mubr.bf16.vlgmr.msra.gmra.mxu1 %v1550_v15  ;;  %2876 = vmatprep.mubr.msk.f32.mxu0 %vm3083_vm0, %v3082_v2 }
 0x96a   :  { %2887 = vmatprep.mubr.msk.f32.mxu1 %vm3083_vm0, %v3082_v2  ;;  %2861 = vmatpush3.msra.mxu0 %v3614_v18 }
 0x96b   :  { %2862 = vmatprep.subr.mxu0 %v3082_v2  ;;  %2880 = vmatpush3.msra.mxu1 %v1775_v25 }
 0x96c   :  { %2863 = vmatpush3.msra.mxu0 %v3621_v19  ;;  %2881 = vmatprep.subr.mxu1 %v3082_v2 }
 0x96d   :  { %2864 = vmatprep.subr.mxu0 %v3082_v2  ;;  %2882 = vmatpush3.msra.mxu1 %v1774_v26 }
 0x96e   :  { %2865 = vmatpush3.msra.mxu0 %v3628_v20  ;;  %2883 = vmatprep.subr.mxu1 %v3082_v2 }
 0x96f   :  { %2866 = vmatprep.subr.mxu0 %v3082_v2  ;;  %2884 = vmatpush3.msra.mxu1 %v1773_v28 }
 0x970   :  { %2867 = vmatpush3.msra.mxu0 %v3635_v21  ;;  %2885 = vmatprep.subr.mxu1 %v3082_v2 }
 0x971   :  { %2868 = vmatprep.subr.mxu0 %v3082_v2  ;;  %2886 = vmatpush3.msra.mxu1 %v1772_v46 }
 0x972   :  { %2869 = vmatpush3.msra.mxu0 %v3642_v22  ;;  %2890 = vmatprep.subr.mxu1 %v3082_v2 }
 0x973   :  { %2870 = vmatprep.subr.mxu0 %v3082_v2 }
 0x974   :  { %2871 = vmatpush3.msra.mxu0 %v3648_v23 }
 0x975   :  { %2872 = vmatprep.subr.mxu0 %v3082_v2 }
 0x976   :  { %2873 = vmatpush3.msra.mxu0 %v3654_v24 }
 0x977   :  { %2874 = vmatprep.subr.mxu0 %v3082_v2 }
 0x978   :  { %2875 = vmatpush3.msra.mxu0 %v1764_v27 }
 0x979   :  { %2909 = vmatprep.subr.mxu0 %v3082_v2 }
 0xa28   :  { %v1758_v29 = vpop.f32.mrf.mxu0 }
 0xa29   :  { %v2666_v30 = vpop.f32.mrf.mxu1 }
 0xa2a   :  { %v2858_v31 = vpop.f32.mrf.mxu0 }
 0xa2b   :  { %v2667_v32 = vpop.f32.mrf.mxu1 }
 0xa2c   :  { %v2668_v33 = vadd.f32 %v2667_v32, %v2666_v30  ;;  %v1761_v34 = vpop.f32.mrf.mxu0  ;;  %v3046_v30 = vld [vmem:[%s3822_s18 + $0x18] sm:$0xff]   ;;  %v3047_v32 = vld [vmem:[%s3822_s18 + $0x10] sm:$0xff]  }
 0xa2d   :  { %v2669_v35 = vpop.f32.mrf.mxu1 }
 0xa2e   :  { %v1759_v36 = vadd.f32 %v2668_v33, %v1758_v29  ;;  %v2859_v37 = vpop.f32.mrf.mxu0  ;;  %v3048_v35 = vld [vmem:[%s3822_s18 + $0x8] sm:$0xff]  }
 0xa2f   :  { %v2670_v38 = vpop.f32.mrf.mxu1  ;;  %v2522_v37 = vld [vmem:[%s3821_s17] ss:$0 sm:$0xff] }
 0xa30   :  { %v1776_v39 = vsel %vm1378_vm8, %v1759_v36, 0.0 }
 0xa31   :  { %v1777_v40 = vrot.slane %v1776_v39, 4 }
 0xa33   :  { %v1778_v41 = vadd.f32 %v1777_v40, %v1776_v39 }
 0xa35   :  { %v1779_v42 = vrot.slane %v1778_v41, 2 }
 0xa37   :  { %v1780_v43 = vadd.f32 %v1779_v42, %v1778_v41 }
 0xa39   :  { %v1781_v44 = vrot.slane %v1780_v43, 1 }
 0xa3b   :  { %v1782_v45 = vadd.f32 %v1781_v44, %v1780_v43  ;;  %v3050_v43 = vld [vmem:[%s3824_s20 + $0x18] sm:$0xff]  }
 0xa3d   :  { %2877 = vmatmul.mubr.msk.f32.vlgmr.msra.gmra.mxu0 %vm252_vm1, %v1782_v45 }
 0xa3e   :  { %2910 = vmatpush3.msra.mxu0 %v1775_v25  ;;  %2917 = vmatprep.mubr.msk.f32.mxu0 %vm3083_vm0, %v3082_v2 }
 0xa3f   :  { %2911 = vmatprep.subr.mxu0 %v3082_v2 }
 0xa40   :  { %2912 = vmatpush3.msra.mxu0 %v1774_v26 }
 0xa41   :  { %2913 = vmatprep.subr.mxu0 %v3082_v2 }
 0xa42   :  { %2914 = vmatpush3.msra.mxu0 %v1773_v28 }
 0xa43   :  { %2915 = vmatprep.subr.mxu0 %v3082_v2 }
 0xa44   :  { %2916 = vmatpush3.msra.mxu0 %v1772_v46  ;;  %v3051_v46 = vld [vmem:[%s3824_s20 + $0x10] sm:$0xff]  }
 0xa45   :  { %2920 = vmatprep.subr.bf16.mxu0 %v3082_v2 }
 0xafd   :  { %v1852_v47 = vpop.f32.mrf.mxu0 }
 0xafe   :  { %v1856_v48 = vmul.f32 0.125, %v1852_v47  ;;  %v3052_v47 = vld [vmem:[%s3824_s20 + $0x8] sm:$0xff]  }
 0xaff   :  { %v2878_v49 = vpop.f32.mrf.mxu0 }
 0xb00   :  { %2888 = vmatmul.mubr.msk.f32.vlgmr.msra.gmra.mxu1 %vm1857_vm14, %v1856_v48  ;;  %v3053_v48 = vld [vmem:[%s3824_s20] sm:$0xff]   ;;  %s3087_s20 = smov [#allocation8]  }
 0xb01   :  { %2891 = vmatpush3.msra.mxu1 %v3614_v18  ;;  %2906 = vmatprep.mubr.msk.f32.mxu1 %vm3083_vm0, %v3082_v2  ;;  %v2531_v49 = vld [vmem:[%s3823_s19] ss:$0 sm:$0xff]  ;;  %s2423_s25 = sshll.u32 %s3087_s20, 4  ;;  %s2424_s25 = int_to_ptr.vmem [resolvable:$true] %s2423_s25 }
 0xb02   :  { %2892 = vmatprep.subr.mxu1 %v3082_v2  ;;  %s3060_s19 = scalar_lea.vmem %s2424_s25, 32  ;;  %p3065_p1 = scmp.lt.s32.totalorder %s2424_s25, %s2424_s25 }
 0xb03   :  { %2893 = vmatpush3.msra.mxu1 %v3621_v19  ;;  %p3061_p0 = scmp.ne.s32.totalorder %s2424_s25, %s3060_s19  ;;  %p3066_p2 = scmp.lt.s32.totalorder %s3060_s19, %s3060_s19 }
 0xb04   :  { %2894 = vmatprep.subr.mxu1 %v3082_v2 }
 0xb05   :  { %2895 = vmatpush3.msra.mxu1 %v3628_v20  ;;  %p3067_p3 = por %p3066_p2, %p3065_p1 }
 0xb06   :  { %2896 = vmatprep.subr.mxu1 %v3082_v2 }
 0xb07   :  { %2897 = vmatpush3.msra.mxu1 %v3635_v21  ;;  %v3086_v21 = vmov 1966171168   ;;  %p3068_p4 = pnand %p3067_p3, %p3061_p0 }
 0xb08   :  { %2898 = vmatprep.subr.mxu1 %v3082_v2 }
 0xb09   :  { %2899 = vmatpush3.msra.mxu1 %v3642_v22  ;;  %v2118_v22 = vunpack.c.l.s4 %v3086_v21 }
 0xb0a   :  { %2900 = vmatprep.subr.mxu1 %v3082_v2 }
 0xb0b   :  { %2901 = vmatpush3.msra.mxu1 %v3648_v23  ;;  %v3044_v23 = vld [vmem:[%s3820_s16 + $0x8] sm:$0xff]  }
 0xb0c   :  { %2902 = vmatprep.subr.mxu1 %v3082_v2 }
 0xb0d   :  { %2903 = vmatpush3.msra.mxu1 %v3654_v24  ;;  %v2119_v24 = vunpack.c.0.s8 %v2118_v22 }
 0xb0e   :  { %2904 = vmatprep.subr.mxu1 %v3082_v2 }
 0xb0f   :  { %2905 = vmatpush3.msra.mxu1 %v1764_v27  ;;  %v2122_v25 = vsub.s32 %v2119_v24, %v3347_v58 }
 0xb10   :  { %2940 = vmatprep.subr.bf16.mxu1 %v3082_v2 }
 0xbc0   :  { %v1927_v50 = vpop.f32.mrf.mxu1 }
 0xbc1   :  { %v1934_v51 = vrot.slane %v1927_v50, %v3350_v59 }
 0xbc2   :  { %v2889_v52 = vpop.f32.mrf.mxu1 }
 0xbc3   :  { %v1935_v53 = vsub.f32 %v1759_v36, %v1934_v51  ;;  %v3049_v36 = vld [vmem:[%s3822_s18] sm:$0xff]  }
 0xbc5   :  { %v1936_v54 = vmul.f32 %v1935_v53, %v1935_v53 }
 0xbc7   :  { %v1937_v55 = vsel %vm1378_vm8, %v1936_v54, 0.0 }
 0xbc8   :  { %v1938_v56 = vrot.slane %v1937_v55, 4 }
 0xbca   :  { %v1939_v57 = vadd.f32 %v1938_v56, %v1937_v55 }
 0xbcc   :  { %v1940_v60 = vrot.slane %v1939_v57, 2 }
 0xbce   :  { %v1941_v61 = vadd.f32 %v1940_v60, %v1939_v57  ;;  %v2537_v57 = vld [vmem:[%s3825_s21] ss:$0 sm:$0xff] }
 0xbd0   :  { %v1942_v62 = vrot.slane %v1941_v61, 1 }
 0xbd2   :  { %v1943_v63 = vadd.f32 %v1942_v62, %v1941_v61 }
 0xbd4   :  { %2907 = vmatmul.mubr.msk.f32.vlgmr.msra.gmra.mxu1 %vm252_vm1, %v1943_v63 }
 0xbd5   :  { %2948 = vmatprep.mubr.msk.bf16.mxu1 %vm3083_vm0, %v3082_v2  ;;  %2941 = vmatpush3.bf16.msra.mxu1 %v3046_v30 }
 0xbd6   :  { %2942 = vmatprep.subr.bf16.mxu1 %v3082_v2 }
 0xbd9   :  { %2943 = vmatpush3.bf16.msra.mxu1 %v3047_v32 }
 0xbda   :  { %2944 = vmatprep.subr.bf16.mxu1 %v3082_v2 }
 0xbdd   :  { %2945 = vmatpush3.bf16.msra.mxu1 %v3048_v35 }
 0xbde   :  { %2946 = vmatprep.subr.bf16.mxu1 %v3082_v2 }
 0xbe1   :  { %2947 = vmatpush3.bf16.msra.mxu1 %v3049_v36 }
 0xbe2   :  { %2952 = vmatprep.subr.bf16.mxu1 %v3082_v2 }
 0xc94   :  { %v2013_v0 = vpop.f32.mrf.mxu1 }
 0xc95   :  { %v2017_v1 = vmul.f32 0.125, %v2013_v0 }
 0xc96   :  { %v2908_v3 = vpop.f32.mrf.mxu1 }
 0xc97   :  { %v2019_v4 = vadd.f32 1e-05, %v2017_v1 }
 0xc99   :  { %3058 = vrsqrt.f32 %v2019_v4 }
 0xca6   :  { %v3059_v6 = vpop.eup %3058 }
 0xca7   :  { %v2021_v7 = vmul.f32 %v3059_v6, %v2018_v5 }
 0xca9   :  { %2918 = vmatmul.mubr.msk.f32.vlgmr.msra.gmra.mxu0 %vm1857_vm14, %v2021_v7 }
 0xcaa   :  { %2936 = vmatprep.mubr.msk.bf16.mxu0 %vm3083_vm0, %v3082_v2  ;;  %2921 = vmatpush3.bf16.msra.mxu0 %v3038_v8 }
 0xcab   :  { %2922 = vmatprep.subr.bf16.mxu0 %v3082_v2 }
 0xcae   :  { %2923 = vmatpush3.bf16.msra.mxu0 %v3039_v9 }
 0xcaf   :  { %2924 = vmatprep.subr.bf16.mxu0 %v3082_v2 }
 0xcb2   :  { %2925 = vmatpush3.bf16.msra.mxu0 %v3040_v10 }
 0xcb3   :  { %2926 = vmatprep.subr.bf16.mxu0 %v3082_v2 }
 0xcb6   :  { %2927 = vmatpush3.bf16.msra.mxu0 %v3041_v11 }
 0xcb7   :  { %2928 = vmatprep.subr.bf16.mxu0 %v3082_v2 }
 0xcba   :  { %2929 = vmatpush3.bf16.msra.mxu0 %v3042_v12 }
 0xcbb   :  { %2930 = vmatprep.subr.bf16.mxu0 %v3082_v2 }
 0xcbe   :  { %2931 = vmatpush3.bf16.msra.mxu0 %v3043_v13 }
 0xcbf   :  { %2932 = vmatprep.subr.bf16.mxu0 %v3082_v2 }
 0xcc2   :  { %2933 = vmatpush3.bf16.msra.mxu0 %v3044_v23 }
 0xcc3   :  { %2934 = vmatprep.subr.bf16.mxu0 %v3082_v2 }
 0xd69   :  { %v2091_v14 = vpop.f32.mrf.mxu0 }
 0xd6a   :  { %v2098_v15 = vrot.slane %v2091_v14, %v3350_v59  ;;  %v3045_v59 = vld [vmem:[%s3820_s16] sm:$0xff]  }
 0xd6b   :  { %v2919_v17 = vpop.f32.mrf.mxu0  ;;  %2935 = vmatpush3.bf16.msra.mxu0 %v3045_v59 }
 0xd6c   :  { %v2099_v18 = vmul.f32 %v2098_v15, %v1935_v53 }
 0xd6e   :  { %v2107_v19 = vadd.f32 %v2521_v16, %v2099_v18 }
 0xd70   :  { %v2108_v20 = vmax.f32 %v2107_v19, 0.0 }
 0xd72   :  { %2109 = vst.msk [vmem:[#allocation6] sm:$0xf] %vm1378_vm8, %v2108_v20 }
 0xd79   :  { %v2114_v26 = vld [vmem:[#allocation6 + $0x1] ss:$2 sm:$0x3]  ;;  %v2110_v27 = vld [vmem:[#allocation6] ss:$2 sm:$0x3] }
 0xd7a   :  { %v2115_v28 = vpack.c.bf16 %v2114_v26, %v2114_v26  ;;  %v2111_v29 = vpack.c.bf16 %v2110_v27, %v2110_v27 }
 0xd7c   :  { %v2123_v31 = vrot.slane %v2115_v28, %v2122_v25  ;;  %2112 = vst.msk [vmem:[#allocation7] sm:$0x1] %vm1384_vm10, %v2111_v29 }
 0xd7e   :  { %v2130_v33 = vrot.slane %v2123_v31, %v2122_v25 }
 0xd80   :  { %2131 = vrot.lane.b32.xlu0 %v2130_v33, %s3084_s27 }
 0xdf2   :  { %v2132_v58 = vpop.permute.xlu0 %2131 }
 0xdf3   :  { %2134 = vst.msk [vmem:[#allocation7] sm:$0x1] %vm1400_vm12, %v2132_v58 }
 0xdfa   :  { %v2135_v34 = vld [vmem:[#allocation7] sm:$0x1] }
 0xdfb   :  { %2937 = vmatmul.mubr.bf16.vlgmr.msra.gmra.mxu0 %v2135_v34 }
 0xebb   :  { %v2241_v38 = vpop.f32.mrf.mxu0 }
 0xebc   :  { %v2242_v39 = vadd.f32 %v2522_v37, %v2241_v38 }
 0xebd   :  { %v2938_v40 = vpop.f32.mrf.mxu0 }
 0xebe   :  { %v2247_v41 = vmax.f32 %v2242_v39, 0.0 }
 0xebf   :  { %v2244_v42 = vpop.f32.mrf.mxu0 }
 0xec0   :  { %v2248_v44 = vpack.c.bf16 %v2247_v41, %v2247_v41 }
 0xec1   :  { %v2939_v45 = vpop.f32.mrf.mxu0 }
 0xec2   :  { %2949 = vmatmul.mubr.msk.bf16.vlgmr.msra.gmra.mxu1 %vm252_vm1, %v2248_v44 }
 0xec3   :  { %2953 = vmatpush3.bf16.msra.mxu1 %v3050_v43  ;;  %2960 = vmatprep.mubr.msk.bf16.mxu1 %vm3083_vm0, %v3082_v2 }
 0xec4   :  { %2954 = vmatprep.subr.bf16.mxu1 %v3082_v2 }
 0xec7   :  { %2955 = vmatpush3.bf16.msra.mxu1 %v3051_v46 }
 0xec8   :  { %2956 = vmatprep.subr.bf16.mxu1 %v3082_v2 }
 0xecb   :  { %2957 = vmatpush3.bf16.msra.mxu1 %v3052_v47 }
 0xecc   :  { %2958 = vmatprep.subr.bf16.mxu1 %v3082_v2 }
 0xecf   :  { %2959 = vmatpush3.bf16.msra.mxu1 %v3053_v48 }
 0xf82   :  { %v2325_v50 = vpop.f32.mrf.mxu1 }
 0xf83   :  { %v2326_v51 = vadd.f32 %v2531_v49, %v2325_v50 }
 0xf84   :  { %v2950_v52 = vpop.f32.mrf.mxu1 }
 0xf85   :  { %v2331_v53 = vmax.f32 %v2326_v51, 0.0 }
 0xf86   :  { %v2328_v54 = vpop.f32.mrf.mxu1 }
 0xf87   :  { %v2332_v55 = vpack.c.bf16 %v2331_v53, %v2331_v53 }
 0xf88   :  { %v2951_v56 = vpop.f32.mrf.mxu1 }
 0xf89   :  { %2961 = vmatmul.mubr.msk.bf16.vlgmr.msra.gmra.mxu1 %vm252_vm1, %v2332_v55 }
0x1049   :  { %v2409_v60 = vpop.f32.mrf.mxu1 }
0x104a   :  { %v2410_v2 = vadd.f32 %v2537_v57, %v2409_v60 }
0x104b   :  { %v2962_v61 = vpop.f32.mrf.mxu1 }
0x104c   :  { %v2415_v62 = vmax.f32 %v2410_v2, 0.0 }
0x104d   :  { %v2412_v63 = vpop.f32.mrf.mxu1 }
0x104e   :  { %2416 = vst [vmem:[#allocation8] sm:$0x3] %v2415_v62 }
0x104f   :  { %v2963_v0 = vpop.f32.mrf.mxu1 }
0x1050   :  { %3071 = shalt.err (!%p3068_p4)
}
0x1051   :  { %2426 = dma.vmem_to_hbm [thread:$0]  %s2424_s25, 32, %s3826_s22, [#allocation9]  }
0x1052   :  { %3080 = dma.done.wait [#allocation9], 32  }
0x1053   :  { %3081 = vsyncadd [#allocation9], 4294967264 }
0x1054   :  { %2430 = vsyncpa [#allocation9], 1 }

</bundles_post_ra>
